<compile_context>
chip_gen: v7x
topology: tpu7x:2x2x1
jax: 0.10.0
libtpu: 0.0.40
codegen_flags: <defaults>
</compile_context>

<pallas_src>
import jax
import jax.numpy as jnp
from jax import lax
from jax.experimental import pallas as pl
from jax.experimental.pallas import tpu as pltpu

LANES = 128


# ----------------------------------------------------------------------------- kernel
def cnnrnn_kernel(p_ref, cw_ref, cb_ref, wih_ref, bg_ref,
                  w1_ref, b1_ref, w2_ref, b2_ref, out_ref):
    tile_n, hw, kpad = p_ref.shape
    hid = cw_ref.shape[1]

    # --- CNN: 3x3/pad-1 conv as ONE fused matmul on the pre-im2col'd bf16 slab ---
    patches = p_ref[...].reshape(tile_n * hw, kpad)            # bf16, no cast
    feat = jnp.dot(patches, cw_ref[...],
                   preferred_element_type=jnp.float32)          # (tile_n*HW, hid) f32
    feat = jnp.maximum(feat + cb_ref[...], 0.0)                 # bias + ReLU

    # --- global average pool (1/HW scale folded into wih in the wrapper) --------
    pooled = jnp.sum(feat.reshape(tile_n, hw, hid), axis=1)     # (tile_n, hid) f32

    # --- RNN: single LSTM step, zero (h0, c0); forget gate dead since c0 == 0 ---
    # gates padded to 128 lanes: columns [i | g | o | zero-pad]
    gates = (jnp.dot(pooled.astype(wih_ref.dtype), wih_ref[...],
                     preferred_element_type=jnp.float32)
             + bg_ref[...])                                     # (tile_n, 128)
    i_g = jax.nn.sigmoid(gates[:, 0 * hid:1 * hid])
    g_g = jnp.tanh(gates[:, 1 * hid:2 * hid])
    o_g = jax.nn.sigmoid(gates[:, 2 * hid:3 * hid])
    hvec = o_g * jnp.tanh(i_g * g_g)                            # (tile_n, hid)

    # --- classifier: Linear -> exact GELU -> Dropout(eval=identity) -> Linear ---
    z = (jnp.dot(hvec.astype(w1_ref.dtype), w1_ref[...],
                 preferred_element_type=jnp.float32) + b1_ref[...])
    z = 0.5 * z * (1.0 + lax.erf(z * 0.7071067811865476))
    # TODO(synk): Dropout(0.1) is identity in inference mode (no RNG applied).
    out = (jnp.dot(z.astype(w2_ref.dtype), w2_ref[...],
                   preferred_element_type=jnp.float32) + b2_ref[...])
    out_ref[...] = out.astype(out_ref.dtype)                    # (tile_n, 128) lane-dense


# ----------------------------------------------------------------------------- prep
def _prep_params(torch_params, spatial_hw, k_pad, out_pad):
    """One-time conversion of PyTorch-layout params into kernel layouts."""
    conv_w, conv_b, w_ih, b_ih, b_hh, fc1_w, fc1_b, fc2_w, fc2_b = torch_params
    hid = conv_w.shape[0]
    c = conv_w.shape[1]
    out_size = fc2_w.shape[0]
    bf16 = jnp.bfloat16

    # Conv2d weight (hid, C, 3, 3) -> fused (9*C, hid), zero-padded to (k_pad, hid).
    # Row order kh*3C + kw*C + c matches the wrapper's im2col tap order.
    cw = conv_w.transpose(2, 3, 1, 0).reshape(9 * c, hid)
    cw = jnp.zeros((k_pad, hid), jnp.float32).at[:9 * c, :].set(cw)
    cb = conv_b.reshape(1, hid)

    # LSTM: gates = x @ W_ih^T + (b_ih + b_hh); PyTorch gate order (i, f, g, o).
    # c0 == 0 -> forget gate dead: prune its columns.  Fold the 1/HW pool scale.
    # Pad gate columns 96 -> 128 for full-vreg elementwise work downstream.
    wih_t = w_ih.T                                                    # (hid, 4*hid)
    wih3 = jnp.concatenate([wih_t[:, :hid], wih_t[:, 2 * hid:]], axis=1)  # i, g, o
    wih3 = wih3 * (1.0 / float(spatial_hw))
    wih3 = jnp.zeros((hid, LANES), jnp.float32).at[:, :3 * hid].set(wih3)
    bg = b_ih + b_hh
    bg3 = jnp.concatenate([bg[:hid], bg[2 * hid:]])
    bg3 = jnp.zeros((1, LANES), jnp.float32).at[:, :3 * hid].set(bg3)

    w1 = fc1_w.T
    b1 = fc1_b.reshape(1, hid)

    # Pad the narrow classifier output to a lane-dense 128-wide slab.
    w2 = jnp.zeros((hid, out_pad), jnp.float32).at[:, :out_size].set(fc2_w.T)
    b2 = jnp.zeros((1, out_pad), jnp.float32).at[:, :out_size].set(fc2_b)

    kparams = (cw.astype(bf16), cb.astype(jnp.float32),
               wih3.astype(bf16), bg3.astype(jnp.float32),
               w1.astype(bf16), b1.astype(jnp.float32),
               w2.astype(bf16), b2.astype(jnp.float32))
    return kparams, out_size


def _pick_tile_n(n_pad, hw):
    """Largest multiple-of-8 divisor of n_pad that keeps the bf16 patch tile
    around <= 4 MiB and leaves >= 2 grid steps (so "parallel" feeds both
    TensorCores on v7x); falls back to n_pad for tiny batches."""
    max_tile = min(n_pad, max(8, ((4 << 20) // (hw * LANES * 2)) // 8 * 8))
    if n_pad // 8 < 2:
        return n_pad
    best = 8
    for t in range(8, max_tile + 1, 8):
        if n_pad % t == 0 and n_pad // t >= 2:
            best = t
    return best


# ----------------------------------------------------------------------------- wrapper
def cnnrnn_forward(x, torch_params, *, tile_n=None):
    n, c, h, w = x.shape
    hw = h * w
    k_pad = LANES                      # 9*C zero-padded to a full 128-lane K
    out_pad = LANES
    kparams, out_size = _prep_params(torch_params, hw, k_pad, out_pad)

    # --- wrapper-side im2col: lane-dense (N_pad, HW, 128) bf16 slab --------------
    xn = x.transpose(0, 2, 3, 1)                                   # NHWC f32
    xpad = jnp.pad(xn, ((0, 0), (1, 1), (1, 1), (0, 0)))           # "same" pad
    taps = [xpad[:, dh:dh + h, dw:dw + w, :]
            for dh in range(3) for dw in range(3)]                 # 9 x (N,H,W,C)
    patches = jnp.stack(taps, axis=3).reshape(n, hw, 9 * c)        # (N, HW, 9C)

    n_pad = -(-n // 8) * 8                                         # batch -> mult of 8
    patches = jnp.pad(patches,
                      ((0, n_pad - n), (0, 0), (0, k_pad - 9 * c))
                      ).astype(jnp.bfloat16)                       # (N_pad, HW, 128)

    if tile_n is None:
        tile_n = _pick_tile_n(n_pad, hw)
    grid = (n_pad // tile_n,)

    in_specs = [pl.BlockSpec((tile_n, hw, k_pad), lambda i: (i, 0, 0))]
    # Weights: constant index_map -> resident across grid steps.
    in_specs += [pl.BlockSpec(p.shape, lambda i, nd=p.ndim: (0,) * nd)
                 for p in kparams]

    out_padded = pl.pallas_call(
        cnnrnn_kernel,
        out_shape=jax.ShapeDtypeStruct((n_pad, out_pad), jnp.float32),
        grid=grid,
        in_specs=in_specs,
        out_specs=pl.BlockSpec((tile_n, out_pad), lambda i: (i, 0)),
        compiler_params=pltpu.CompilerParams(
            dimension_semantics=("parallel",),
            vmem_limit_bytes=32 * 1024 * 1024),
    )(patches, *kparams)
    return out_padded[:n, :out_size]


# ----------------------------------------------------------------------------- reference
def cnnrnn_reference(x, torch_params):
    conv_w, conv_b, w_ih, b_ih, b_hh, fc1_w, fc1_b, fc2_w, fc2_b = torch_params
    hid = conv_w.shape[0]
    feat = lax.conv_general_dilated(
        x, conv_w, window_strides=(1, 1), padding=((1, 1), (1, 1)),
        dimension_numbers=('NCHW', 'OIHW', 'NCHW'))
    feat = jnp.maximum(feat + conv_b[None, :, None, None], 0.0)
    pooled = jnp.mean(feat, axis=(2, 3))                          # (N, hid)
    gates = pooled @ w_ih.T + b_ih + b_hh                         # order i, f, g, o
    i_g = jax.nn.sigmoid(gates[:, 0 * hid:1 * hid])
    g_g = jnp.tanh(gates[:, 2 * hid:3 * hid])
    o_g = jax.nn.sigmoid(gates[:, 3 * hid:4 * hid])
    hvec = o_g * jnp.tanh(i_g * g_g)                              # c0 == 0
    z = hvec @ fc1_w.T + fc1_b
    z = 0.5 * z * (1.0 + lax.erf(z / jnp.sqrt(2.0)))
    return z @ fc2_w.T + fc2_b


# ----------------------------------------------------------------------------- main
if __name__ == "__main__":
    # Small shapes consistent with the module (batch sized for 8-row tiles x 2 steps).
    N, C, H, W = 16, 4, 16, 16       # NCHW input to the CNN
    HIDDEN = 32                      # rnn hidden_size (== rnn input_size)
    OUT = 8                          # rnn_params['output_size']

    key = jax.random.PRNGKey(0)
    ks = jax.random.split(key, 10)
    s = 0.1
    torch_params = (
        s * jax.random.normal(ks[0], (HIDDEN, C, 3, 3), jnp.float32),     # Conv2d weight (O,I,kh,kw)
        s * jax.random.normal(ks[1], (HIDDEN,), jnp.float32),             # Conv2d bias
        s * jax.random.normal(ks[2], (4 * HIDDEN, HIDDEN), jnp.float32),  # LSTM W_ih (i,f,g,o)
        s * jax.random.normal(ks[3], (4 * HIDDEN,), jnp.float32),         # LSTM b_ih
        s * jax.random.normal(ks[4], (4 * HIDDEN,), jnp.float32),         # LSTM b_hh
        s * jax.random.normal(ks[5], (HIDDEN, HIDDEN), jnp.float32),      # classifier fc1 weight
        s * jax.random.normal(ks[6], (HIDDEN,), jnp.float32),             # classifier fc1 bias
        s * jax.random.normal(ks[7], (OUT, HIDDEN), jnp.float32),         # classifier fc2 weight
        s * jax.random.normal(ks[8], (OUT,), jnp.float32),                # classifier fc2 bias
    )
    x = jax.random.normal(ks[9], (N, C, H, W), jnp.float32)

    out = jax.block_until_ready(cnnrnn_forward(x, torch_params))
    ref = jax.block_until_ready(cnnrnn_reference(x, torch_params))

    assert out.shape == (N, OUT), out.shape
    max_err = jnp.max(jnp.abs(out - ref))
    assert jnp.allclose(out, ref, rtol=2e-2, atol=2e-2), \
        f"Pallas output mismatch vs reference (max abs err {max_err})"

    print("KERNEL_OK")
</pallas_src>

<mosaic_0001>
module attributes {stable_mosaic.version = 11 : i64} {
  func.func @cnnrnn_kernel(%arg0: i32, %arg1: memref<8x256x128xbf16, #tpu.memory_space<vmem>>, %arg2: memref<128x32xbf16, #tpu.memory_space<vmem>>, %arg3: memref<1x32xf32, #tpu.memory_space<vmem>>, %arg4: memref<32x128xbf16, #tpu.memory_space<vmem>>, %arg5: memref<1x128xf32, #tpu.memory_space<vmem>>, %arg6: memref<32x32xbf16, #tpu.memory_space<vmem>>, %arg7: memref<1x32xf32, #tpu.memory_space<vmem>>, %arg8: memref<32x128xbf16, #tpu.memory_space<vmem>>, %arg9: memref<1x128xf32, #tpu.memory_space<vmem>>, %arg10: memref<8x128xf32, #tpu.memory_space<vmem>>) attributes {dimension_semantics = [#tpu.dimension_semantics<parallel>], iteration_bounds = array<i64: 2>, scalar_prefetch = 0 : i64, scratch_operands = 0 : i64, tpu.core_type = #tpu.core_type<tc>, window_params = [{transform_indices = @transform_0, window_bounds = array<i64: 8, 256, 128>}, {pipeline_mode = #tpu.pipeline_mode<synchronous>, transform_indices = @transform_1, window_bounds = array<i64: 128, 32>}, {pipeline_mode = #tpu.pipeline_mode<synchronous>, transform_indices = @transform_2, window_bounds = array<i64: 1, 32>}, {pipeline_mode = #tpu.pipeline_mode<synchronous>, transform_indices = @transform_3, window_bounds = array<i64: 32, 128>}, {pipeline_mode = #tpu.pipeline_mode<synchronous>, transform_indices = @transform_4, window_bounds = array<i64: 1, 128>}, {pipeline_mode = #tpu.pipeline_mode<synchronous>, transform_indices = @transform_5, window_bounds = array<i64: 32, 32>}, {pipeline_mode = #tpu.pipeline_mode<synchronous>, transform_indices = @transform_6, window_bounds = array<i64: 1, 32>}, {pipeline_mode = #tpu.pipeline_mode<synchronous>, transform_indices = @transform_7, window_bounds = array<i64: 32, 128>}, {pipeline_mode = #tpu.pipeline_mode<synchronous>, transform_indices = @transform_8, window_bounds = array<i64: 1, 128>}, {transform_indices = @transform_9, window_bounds = array<i64: 8, 128>}]} {
    %c0 = arith.constant 0 : index
    %c0_0 = arith.constant 0 : index
    %c0_1 = arith.constant 0 : index
    %0 = vector.load %arg1[%c0, %c0_0, %c0_1] : memref<8x256x128xbf16, #tpu.memory_space<vmem>>, vector<8x256x128xbf16>
    %1 = vector.shape_cast %0 : vector<8x256x128xbf16> to vector<2048x128xbf16>
    %c0_2 = arith.constant 0 : index
    %c0_3 = arith.constant 0 : index
    %2 = vector.load %arg2[%c0_2, %c0_3] : memref<128x32xbf16, #tpu.memory_space<vmem>>, vector<128x32xbf16>
    %cst = arith.constant dense<0.000000e+00> : vector<2048x32xf32>
    %3 = tpu.matmul %1, %2, %cst {dimension_numbers = #tpu.dot_dimension_numbers<[1], [0], [0], [1], [0, 0, 1, 1], [], []>} : vector<2048x128xbf16>, vector<128x32xbf16>, vector<2048x32xf32> -> vector<2048x32xf32>
    %c0_4 = arith.constant 0 : index
    %c0_5 = arith.constant 0 : index
    %4 = vector.load %arg3[%c0_4, %c0_5] : memref<1x32xf32, #tpu.memory_space<vmem>>, vector<1x32xf32>
    %5 = vector.broadcast %4 : vector<1x32xf32> to vector<2048x32xf32>
    %6 = arith.addf %3, %5 : vector<2048x32xf32>
    %cst_6 = arith.constant 0.000000e+00 : f32
    %7 = vector.broadcast %cst_6 : f32 to vector<2048x32xf32>
    %8 = arith.maximumf %6, %7 : vector<2048x32xf32>
    %9 = vector.shape_cast %8 : vector<2048x32xf32> to vector<8x256x32xf32>
    %cst_7 = arith.constant dense<0.000000e+00> : vector<8x32xf32>
    %10 = vector.multi_reduction <add>, %9, %cst_7 [1] : vector<8x256x32xf32> to vector<8x32xf32>
    %11 = arith.truncf %10 : vector<8x32xf32> to vector<8x32xbf16>
    %c0_8 = arith.constant 0 : index
    %c0_9 = arith.constant 0 : index
    %12 = vector.load %arg4[%c0_8, %c0_9] : memref<32x128xbf16, #tpu.memory_space<vmem>>, vector<32x128xbf16>
    %cst_10 = arith.constant dense<0.000000e+00> : vector<8x128xf32>
    %13 = tpu.matmul %11, %12, %cst_10 {dimension_numbers = #tpu.dot_dimension_numbers<[1], [0], [0], [1], [0, 0, 1, 1], [], []>} : vector<8x32xbf16>, vector<32x128xbf16>, vector<8x128xf32> -> vector<8x128xf32>
    %c0_11 = arith.constant 0 : index
    %c0_12 = arith.constant 0 : index
    %14 = vector.load %arg5[%c0_11, %c0_12] : memref<1x128xf32, #tpu.memory_space<vmem>>, vector<1x128xf32>
    %15 = vector.broadcast %14 : vector<1x128xf32> to vector<8x128xf32>
    %16 = arith.addf %13, %15 : vector<8x128xf32>
    %17 = vector.extract_strided_slice %16 {offsets = [0, 0], sizes = [8, 32], strides = [1, 1]} : vector<8x128xf32> to vector<8x32xf32>
    %18 = arith.negf %17 : vector<8x32xf32>
    %19 = math.exp %18 : vector<8x32xf32>
    %cst_13 = arith.constant 1.000000e+00 : f32
    %20 = vector.broadcast %cst_13 : f32 to vector<8x32xf32>
    %21 = arith.addf %20, %19 : vector<8x32xf32>
    %22 = arith.divf %20, %21 : vector<8x32xf32>
    %23 = vector.extract_strided_slice %16 {offsets = [0, 32], sizes = [8, 32], strides = [1, 1]} : vector<8x128xf32> to vector<8x32xf32>
    %24 = math.tanh %23 : vector<8x32xf32>
    %25 = vector.extract_strided_slice %16 {offsets = [0, 64], sizes = [8, 32], strides = [1, 1]} : vector<8x128xf32> to vector<8x32xf32>
    %26 = arith.negf %25 : vector<8x32xf32>
    %27 = math.exp %26 : vector<8x32xf32>
    %cst_14 = arith.constant 1.000000e+00 : f32
    %28 = vector.broadcast %cst_14 : f32 to vector<8x32xf32>
    %29 = arith.addf %28, %27 : vector<8x32xf32>
    %30 = arith.divf %28, %29 : vector<8x32xf32>
    %31 = arith.mulf %22, %24 : vector<8x32xf32>
    %32 = math.tanh %31 : vector<8x32xf32>
    %33 = arith.mulf %30, %32 : vector<8x32xf32>
    %34 = arith.truncf %33 : vector<8x32xf32> to vector<8x32xbf16>
    %c0_15 = arith.constant 0 : index
    %c0_16 = arith.constant 0 : index
    %35 = vector.load %arg6[%c0_15, %c0_16] : memref<32x32xbf16, #tpu.memory_space<vmem>>, vector<32x32xbf16>
    %cst_17 = arith.constant dense<0.000000e+00> : vector<8x32xf32>
    %36 = tpu.matmul %34, %35, %cst_17 {dimension_numbers = #tpu.dot_dimension_numbers<[1], [0], [0], [1], [0, 0, 1, 1], [], []>} : vector<8x32xbf16>, vector<32x32xbf16>, vector<8x32xf32> -> vector<8x32xf32>
    %c0_18 = arith.constant 0 : index
    %c0_19 = arith.constant 0 : index
    %37 = vector.load %arg7[%c0_18, %c0_19] : memref<1x32xf32, #tpu.memory_space<vmem>>, vector<1x32xf32>
    %38 = vector.broadcast %37 : vector<1x32xf32> to vector<8x32xf32>
    %39 = arith.addf %36, %38 : vector<8x32xf32>
    %cst_20 = arith.constant 5.000000e-01 : f32
    %40 = vector.broadcast %cst_20 : f32 to vector<8x32xf32>
    %41 = arith.mulf %40, %39 : vector<8x32xf32>
    %cst_21 = arith.constant 0.707106769 : f32
    %42 = vector.broadcast %cst_21 : f32 to vector<8x32xf32>
    %43 = arith.mulf %39, %42 : vector<8x32xf32>
    %44 = math.erf %43 : vector<8x32xf32>
    %cst_22 = arith.constant 1.000000e+00 : f32
    %45 = vector.broadcast %cst_22 : f32 to vector<8x32xf32>
    %46 = arith.addf %45, %44 : vector<8x32xf32>
    %47 = arith.mulf %41, %46 : vector<8x32xf32>
    %48 = arith.truncf %47 : vector<8x32xf32> to vector<8x32xbf16>
    %c0_23 = arith.constant 0 : index
    %c0_24 = arith.constant 0 : index
    %49 = vector.load %arg8[%c0_23, %c0_24] : memref<32x128xbf16, #tpu.memory_space<vmem>>, vector<32x128xbf16>
    %cst_25 = arith.constant dense<0.000000e+00> : vector<8x128xf32>
    %50 = tpu.matmul %48, %49, %cst_25 {dimension_numbers = #tpu.dot_dimension_numbers<[1], [0], [0], [1], [0, 0, 1, 1], [], []>} : vector<8x32xbf16>, vector<32x128xbf16>, vector<8x128xf32> -> vector<8x128xf32>
    %c0_26 = arith.constant 0 : index
    %c0_27 = arith.constant 0 : index
    %51 = vector.load %arg9[%c0_26, %c0_27] : memref<1x128xf32, #tpu.memory_space<vmem>>, vector<1x128xf32>
    %52 = vector.broadcast %51 : vector<1x128xf32> to vector<8x128xf32>
    %53 = arith.addf %50, %52 : vector<8x128xf32>
    %c0_28 = arith.constant 0 : index
    %c0_29 = arith.constant 0 : index
    %54 = vector.load %arg10[%c0_28, %c0_29] : memref<8x128xf32, #tpu.memory_space<vmem>>, vector<8x128xf32>
    tpu.vector_store %arg10[%c0_28, %c0_29], %53 {strides = array<i32>} : memref<8x128xf32, #tpu.memory_space<vmem>>, vector<8x128xf32>,
    return
  }
  func.func @transform_0(%arg0: i32) -> (i32, i32, i32) {
    %c0_i32 = arith.constant 0 : i32
    %c0_i32_0 = arith.constant 0 : i32
    %c0_i32_1 = arith.constant 0 : i32
    return %arg0, %c0_i32, %c0_i32_0 : i32, i32, i32
  }
  func.func @transform_1(%arg0: i32) -> (i32, i32) {
    %c0_i32 = arith.constant 0 : i32
    %c0_i32_0 = arith.constant 0 : i32
    %c0_i32_1 = arith.constant 0 : i32
    return %c0_i32, %c0_i32_0 : i32, i32
  }
  func.func @transform_2(%arg0: i32) -> (i32, i32) {
    %c0_i32 = arith.constant 0 : i32
    %c0_i32_0 = arith.constant 0 : i32
    %c0_i32_1 = arith.constant 0 : i32
    return %c0_i32, %c0_i32_0 : i32, i32
  }
  func.func @transform_3(%arg0: i32) -> (i32, i32) {
    %c0_i32 = arith.constant 0 : i32
    %c0_i32_0 = arith.constant 0 : i32
    %c0_i32_1 = arith.constant 0 : i32
    return %c0_i32, %c0_i32_0 : i32, i32
  }
  func.func @transform_4(%arg0: i32) -> (i32, i32) {
    %c0_i32 = arith.constant 0 : i32
    %c0_i32_0 = arith.constant 0 : i32
    %c0_i32_1 = arith.constant 0 : i32
    return %c0_i32, %c0_i32_0 : i32, i32
  }
  func.func @transform_5(%arg0: i32) -> (i32, i32) {
    %c0_i32 = arith.constant 0 : i32
    %c0_i32_0 = arith.constant 0 : i32
    %c0_i32_1 = arith.constant 0 : i32
    return %c0_i32, %c0_i32_0 : i32, i32
  }
  func.func @transform_6(%arg0: i32) -> (i32, i32) {
    %c0_i32 = arith.constant 0 : i32
    %c0_i32_0 = arith.constant 0 : i32
    %c0_i32_1 = arith.constant 0 : i32
    return %c0_i32, %c0_i32_0 : i32, i32
  }
  func.func @transform_7(%arg0: i32) -> (i32, i32) {
    %c0_i32 = arith.constant 0 : i32
    %c0_i32_0 = arith.constant 0 : i32
    %c0_i32_1 = arith.constant 0 : i32
    return %c0_i32, %c0_i32_0 : i32, i32
  }
  func.func @transform_8(%arg0: i32) -> (i32, i32) {
    %c0_i32 = arith.constant 0 : i32
    %c0_i32_0 = arith.constant 0 : i32
    %c0_i32_1 = arith.constant 0 : i32
    return %c0_i32, %c0_i32_0 : i32, i32
  }
  func.func @transform_9(%arg0: i32) -> (i32, i32) {
    %c0_i32 = arith.constant 0 : i32
    %c0_i32_0 = arith.constant 0 : i32
    return %arg0, %c0_i32 : i32, i32
  }
}

</mosaic_0001>

<bundles_post_ra>
// kernel: tpu_custom_call.1
= control target key start
LH: loop header
LB: loop body
LE: loop exit
PB: predicated region body
PF: predicated region fallthrough
CT: control target
= control target key end

     0   :  { %14 = vsyncpa [#allocation3], 0  ;;  %s5802_s0 = inlined_call_operand.hbm [shape: bf16[16,256,128], index: 0, kind: input, shape index: {}]   ;;  %s5803_s1 = inlined_call_operand.vmem [shape: bf16[128,32], index: 1, kind: input, shape index: {}]   ;;  %s5804_s2 = inlined_call_operand.vmem [shape: f32[1,32], index: 2, kind: input, shape index: {}]   ;;  %s5805_s3 = inlined_call_operand.vmem [shape: bf16[32,128], index: 3, kind: input, shape index: {}]   ;;  %s5806_s4 = inlined_call_operand.vmem [shape: f32[1,128], index: 4, kind: input, shape index: {}]   ;;  %s5807_s5 = inlined_call_operand.vmem [shape: bf16[32,32], index: 5, kind: input, shape index: {}]   ;;  %s5808_s6 = inlined_call_operand.vmem [shape: f32[1,32], index: 6, kind: input, shape index: {}]   ;;  %s5809_s7 = inlined_call_operand.vmem [shape: bf16[32,128], index: 7, kind: input, shape index: {}]   ;;  %s5810_s8 = inlined_call_operand.vmem [shape: f32[1,128], index: 8, kind: input, shape index: {}]   ;;  %s5811_s9 = inlined_call_operand.hbm [shape: f32[16,128], index: 9, kind: output, shape index: {}]  }
   0x1   :  { %16 = vsyncpa [#allocation3 + $0x1], 0 }
   0x2   :  { %17 = vsyncpa [#allocation4], 0 }
   0x3   :  { %19 = vsyncpa [#allocation4 + $0x1], 0  ;;  %s4650_s30 = smov 0   ;;  %s4652_s10 = smov 0  }
   0x4   :  { %s4654_s11 = smov 0   ;;  %s4656_s12 = smov 0  }
   0x5 LB: > { %s4671_s13 = sadd.s32 4294967295, %s4590_s12   ;;  %s3665_s14 = sadd.s32 4294967294, %s4590_s12   ;;  %s4590_s12 = sphi %s4656_s12, %s5835_s12   ;;  %s4586_s11 = sphi %s4654_s11, %s5834_s11   ;;  %s4582_s10 = sphi %s4652_s10, %s5833_s10   ;;  %s4578_s30 = sphi %s4650_s30, %s5832_s30  }
   0x6   : > { %s4675_s15 = sadd.s32 1, %s4590_s12   ;;  %s32_s16 = sadd.s32 1, %s4586_s11 }
   0x7   : > { %s29_s17 = ssub.s32 %s4590_s12, %s4675_s15  ;;  %p39_p0 = scmp.ne.s32.totalorder %s4586_s11, %s4582_s10 }
   0x8   : > { %p30_p1 = scmp.eq.s32.totalorder %s29_s17, 0  ;;  %p40_p2 = scmp.eq.s32.totalorder %s4590_s12, 0 }
   0x9   : > { %p45_p3 = scmp.ne.s32.totalorder %s4582_s10, %s4578_s30  ;;  %p46_p4 = scmp.eq.s32.totalorder %s4671_s13, 0 }
   0xa   : > { %s4687_s18 = scalar_select %p30_p1, %s4586_s11, %s32_s16  }
   0xb   : > { %p4689_p5 = por %p40_p2, %p39_p0  ;;  %p4693_p6 = por %p46_p4, %p45_p3 }
   0xc   : > { %p237_p7 = scmp.eq.s32.totalorder %s4671_s13, 1  ;;  %p243_p8 = scmp.eq.s32.totalorder %s3665_s14, 1 }
   0xd   : > { %p4300_p10 = scmp.lt.s32.totalorder %s4590_s12, 2  ;;  %s287_s23 = sand.u32 1, %s4586_s11  }
   0xe   : > { %p4700_p11 = por %p237_p7, %p39_p0  ;;  %p4704_p12 = por %p243_p8, %p45_p3 }
   0xf   : > { %s3830_s24 = sshll.u32 %s4590_s12, 14  ;;  %s3668_s25 = sshll.u32 %s287_s23, 10 }
  0x10   : > { %s5819_s21 = scalar_select %p4700_p11, 1, 0 }
  0x11   : > { %s5820_s22 = scalar_select %p4704_p12, 1, 0 }
  0x12   : > { %s4713_s28 = scalar_lea.hbm %s5802_s0, %s3830_s24  ;;  %s291_s29 = scalar_lea.vmem [#allocation2], %s3668_s25 }
  0x13   : > { %s299_s14 = sshll.u32 %s291_s29, 4  ;;  %p4717_p13 = pnand %p4300_p10, %p4689_p5  ;;  %s4721_s14 = int_to_ptr.vmem [resolvable:$true] %s299_s14 }
  0x14   : > { %s4723_s17 = scalar_lea.sflag [#allocation3], %s287_s23  ;;  %s4494_s26 = scalar_lea.hbm %s4713_s28, 16384 }
  0x15   : > { %p4495_p0 = scmp.ne.s32.totalorder %s4713_s28, %s4494_s26  ;;  %p4496_p1 = pneg %p4717_p13 }
  0x16   : > { %s4499_s25 = scalar_lea.hbm %s5802_s0, 32768  ;;  %p4500_p4 = scmp.lt.u32.totalorder %s4713_s28, %s5802_s0 }
  0x17   : > { %p4497_p2 = pnand %p4496_p1, %p4495_p0  ;;  %p4501_p5 = scmp.lt.u32.totalorder %s4499_s25, %s4494_s26 }
  0x18   : > { %p4503_p8 = scmp.lt.u32.totalorder %s4494_s26, %s4713_s28 }
  0x19   : > { %p4498_p3 = pneg %p4497_p2  ;;  %p4502_p7 = por %p4501_p5, %p4500_p4 }
  0x1b   : > { %p4504_p10 = por %p4503_p8, %p4502_p7 }
  0x1d   : > { %p4505_p9 = pnand %p4504_p10, %p4498_p3 }
  0x1f   : > { %4508 = shalt.err (!%p4505_p9)
}
  0x20   : > { %s4509_s23 = scalar_lea.vmem %s4721_s14, 16384  ;;  %s4592_s24 = smov [#allocation2]  }
  0x21   : > { %p4510_p0 = scmp.ne.s32.totalorder %s4721_s14, %s4509_s23  ;;  %s4514_s19 = sshll.u32 %s4592_s24, 4  ;;  %s4515_s19 = int_to_ptr.vmem [resolvable:$false] %s4514_s19 }
  0x22   : > { %s4516_s27 = scalar_lea.vmem %s4515_s19, 32768  ;;  %p4517_p11 = scmp.lt.s32.totalorder %s4721_s14, %s4515_s19 }
  0x23   : > { %p4512_p2 = pnand %p4510_p0, %p4496_p1  ;;  %p4518_p4 = scmp.lt.s32.totalorder %s4516_s27, %s4509_s23 }
  0x25   : > { %p4513_p12 = pneg %p4512_p2  ;;  %p4519_p5 = por %p4518_p4, %p4517_p11 }
  0x27   : > { %p4520_p7 = pnand %p4519_p5, %p4513_p12 }
  0x29   : > { %4523 = shalt.err (!%p4520_p7)
}
  0x2a   : > { %s4593_s26 = smov 64   ;;  %s4594_s25 = smov 4  }
  0x2b   : > { %4295 = dma.hbm_to_vmem [thread:$0]  (!%p4717_p13), %s4713_s28, 16384, %s4721_s14, %s4723_s17, %s4593_s26, %s4593_s26, %s4594_s25  }
  0x2c   : > { %p3672_p9 = scmp.ge.s32.totalorder %s4590_s12, 1  ;;  %p307_p1 = scmp.lt.s32.totalorder %s4590_s12, 3 }
  0x2e   : > { %p308_p3 = pnand %p3672_p9, %p307_p1 }
  0x30   : > { %311 = sbr.rel (%p308_p3) target bundleno = 1700 (0x6a4), region = 56 }
  0x37   : > { %s4754_s29 = sand.u32 1, %s4582_s10  }
  0x38   : > { %s3673_s23 = sshll.u32 %s4754_s29, 10  ;;  %s314_s24 = scalar_lea.sflag [#allocation3], %s4754_s29 }
  0x39   : > { %s4758_s19 = scalar_lea.vmem [#allocation2], %s3673_s23 }
  0x3a   : > { %4569 = dma.done.wait (%p4693_p6), %s314_s24, 16384  }
  0x3b   : > { %4571 = vsyncadd (%p4693_p6), %s314_s24, 4294950912  ;;  %v4340_v0 = vld [vmem:[%s5803_s1] sm:$0xff]   ;;  %v4341_v1 = vld [vmem:[%s5803_s1 + $0x8] sm:$0xff]   ;;  %vm2762_vm0 = vcmask 261120   ;;  %vm3350_vm1 = vcmask 1041409   ;;  %vm3352_vm2 = vcmask 1042434  }
  0x3c   : > { %3976 = vmatprep.subr.bf16.mxu0 %v4340_v0  ;;  %4272 = vmatprep.subr.bf16.mxu1 %v4340_v0  ;;  %v4342_v2 = vld [vmem:[%s5803_s1 + $0x10] sm:$0xff]   ;;  %v4343_v3 = vld [vmem:[%s5803_s1 + $0x18] sm:$0xff]   ;;  %v4348_v4 = vld [vmem:[%s4758_s19] sm:$0xff]   ;;  %vm4596_vm3 = vmmov 0   ;;  %vm3354_vm4 = vcmask 1043459   ;;  %vm3356_vm5 = vcmask 1044484  }
  0x3d   : > { %3977 = vmatpush3.bf16.msra.mxu0 %v4340_v0  ;;  %4280 = vmatpush3.bf16.msra.mxu1 %v4340_v0  ;;  %v4344_v5 = vld [vmem:[%s5803_s1 + $0x20] sm:$0xff]   ;;  %v4345_v6 = vld [vmem:[%s5803_s1 + $0x28] sm:$0xff]   ;;  %v4346_v7 = vld [vmem:[%s5803_s1 + $0x30] sm:$0xff]   ;;  %vm3358_vm6 = vcmask 1045509   ;;  %vm3360_vm7 = vcmask 1046534   ;;  %vm3362_vm8 = vcmask 1047559  }
  0x3e   : > { %3978 = vmatprep.subr.bf16.mxu0 %v4341_v1  ;;  %4273 = vmatprep.subr.bf16.mxu1 %v4341_v1  ;;  %v4347_v8 = vld [vmem:[%s5803_s1 + $0x38] sm:$0xff]   ;;  %v4366_v9 = vld [vmem:[%s4758_s19 + $0x220] sm:$0xff]   ;;  %v4349_v10 = vld [vmem:[%s4758_s19 + $0x8] sm:$0xff]   ;;  %s4597_s25 = smov 96   ;;  %s4598_s14 = smov 64  }
  0x3f   : > { %3992 = vmatprep.mubr.bf16.mxu0 %v4348_v4  ;;  %v4350_v11 = vld [vmem:[%s4758_s19 + $0x10] sm:$0xff]   ;;  %4128 = vmatprep.mubr.bf16.mxu1 %v4366_v9  ;;  %v4367_v12 = vld [vmem:[%s4758_s19 + $0x228] sm:$0xff]   ;;  %v4351_v14 = vld [vmem:[%s4758_s19 + $0x18] sm:$0xff]   ;;  %s3674_s23 = sshll.u32 %s4754_s29, 3  ;;  %s3826_s28 = sshll.u32 %s4671_s13, 7 }
  0x40   : > { %v4370_v13 = vld [vmem:[%s4758_s19 + $0x230] sm:$0xff]   ;;  %v4352_v15 = vld [vmem:[%s4758_s19 + $0x20] sm:$0xff]   ;;  %v4371_v16 = vld [vmem:[%s4758_s19 + $0x238] sm:$0xff]   ;;  %s5758_s26 = scalar_lea.hbm %s5811_s9, %s3826_s28  ;;  %s3582_s20 = scalar_lea.sflag [#allocation4], %s4754_s29 }
  0x41   : > { %3979 = vmatpush3.bf16.msra.mxu0 %v4341_v1  ;;  %4281 = vmatpush3.bf16.msra.mxu1 %v4341_v1  ;;  %v4374_v17 = vld [vmem:[%s4758_s19 + $0x240] sm:$0xff]   ;;  %v4353_v18 = vld [vmem:[%s4758_s19 + $0x28] sm:$0xff]   ;;  %v4354_v19 = vld [vmem:[%s4758_s19 + $0x30] sm:$0xff]   ;;  %p5829_p11 = scmp.ne.s32.totalorder %s5819_s21, 0 }
  0x42   : > { %3980 = vmatprep.subr.bf16.mxu0 %v4342_v2  ;;  %4274 = vmatprep.subr.bf16.mxu1 %v4342_v2  ;;  %v4375_v20 = vld [vmem:[%s4758_s19 + $0x248] sm:$0xff]   ;;  %v4378_v21 = vld [vmem:[%s4758_s19 + $0x250] sm:$0xff]   ;;  %v4355_v22 = vld [vmem:[%s4758_s19 + $0x38] sm:$0xff]  }
  0x43   : > { %v4356_v23 = vld [vmem:[%s4758_s19 + $0x40] sm:$0xff]   ;;  %v4379_v24 = vld [vmem:[%s4758_s19 + $0x258] sm:$0xff]   ;;  %v4357_v26 = vld [vmem:[%s4758_s19 + $0x48] sm:$0xff]  }
  0x44   : > { %v4382_v25 = vld [vmem:[%s4758_s19 + $0x260] sm:$0xff]   ;;  %v4358_v27 = vld [vmem:[%s4758_s19 + $0x50] sm:$0xff]   ;;  %v4383_v28 = vld [vmem:[%s4758_s19 + $0x268] sm:$0xff]  }
  0x45   : > { %3981 = vmatpush3.bf16.msra.mxu0 %v4342_v2  ;;  %4282 = vmatpush3.bf16.msra.mxu1 %v4342_v2  ;;  %v4386_v29 = vld [vmem:[%s4758_s19 + $0x270] sm:$0xff]   ;;  %v4359_v30 = vld [vmem:[%s4758_s19 + $0x58] sm:$0xff]   ;;  %v4360_v31 = vld [vmem:[%s4758_s19 + $0x60] sm:$0xff]  }
  0x46   : > { %3982 = vmatprep.subr.bf16.mxu0 %v4343_v3  ;;  %4275 = vmatprep.subr.bf16.mxu1 %v4343_v3  ;;  %v4387_v32 = vld [vmem:[%s4758_s19 + $0x278] sm:$0xff]   ;;  %v4390_v33 = vld [vmem:[%s4758_s19 + $0x280] sm:$0xff]   ;;  %v4361_v34 = vld [vmem:[%s4758_s19 + $0x68] sm:$0xff]  }
  0x47   : > { %v4362_v35 = vld [vmem:[%s4758_s19 + $0x70] sm:$0xff]   ;;  %v4391_v36 = vld [vmem:[%s4758_s19 + $0x288] sm:$0xff]   ;;  %v4363_v38 = vld [vmem:[%s4758_s19 + $0x78] sm:$0xff]  }
  0x48   : > { %v4394_v37 = vld [vmem:[%s4758_s19 + $0x290] sm:$0xff]   ;;  %v4395_v39 = vld [vmem:[%s4758_s19 + $0x298] sm:$0xff]   ;;  %v4364_v40 = vld [vmem:[%s4758_s19 + $0x80] sm:$0xff]  }
  0x49   : > { %3983 = vmatpush3.bf16.msra.mxu0 %v4343_v3  ;;  %4283 = vmatpush3.bf16.msra.mxu1 %v4343_v3  ;;  %v4398_v41 = vld [vmem:[%s4758_s19 + $0x2a0] sm:$0xff]   ;;  %v4365_v42 = vld [vmem:[%s4758_s19 + $0x88] sm:$0xff]   ;;  %v4368_v44 = vld [vmem:[%s4758_s19 + $0x90] sm:$0xff]  }
  0x4a   : > { %3984 = vmatprep.subr.bf16.mxu0 %v4344_v5  ;;  %4276 = vmatprep.subr.bf16.mxu1 %v4344_v5  ;;  %v4399_v43 = vld [vmem:[%s4758_s19 + $0x2a8] sm:$0xff]   ;;  %v4402_v45 = vld [vmem:[%s4758_s19 + $0x2b0] sm:$0xff]   ;;  %v4369_v46 = vld [vmem:[%s4758_s19 + $0x98] sm:$0xff]  }
  0x4b   : > { %v4403_v47 = vld [vmem:[%s4758_s19 + $0x2b8] sm:$0xff]   ;;  %v4372_v48 = vld [vmem:[%s4758_s19 + $0xa0] sm:$0xff]   ;;  %v4373_v50 = vld [vmem:[%s4758_s19 + $0xa8] sm:$0xff]  }
  0x4c   : > { %v4406_v49 = vld [vmem:[%s4758_s19 + $0x2c0] sm:$0xff]   ;;  %v4407_v51 = vld [vmem:[%s4758_s19 + $0x2c8] sm:$0xff]   ;;  %v4376_v52 = vld [vmem:[%s4758_s19 + $0xb0] sm:$0xff]  }
  0x4d   : > { %3985 = vmatpush3.bf16.msra.mxu0 %v4344_v5  ;;  %4284 = vmatpush3.bf16.msra.mxu1 %v4344_v5  ;;  %v4410_v53 = vld [vmem:[%s4758_s19 + $0x2d0] sm:$0xff]   ;;  %v4377_v54 = vld [vmem:[%s4758_s19 + $0xb8] sm:$0xff]   ;;  %v4380_v55 = vld [vmem:[%s4758_s19 + $0xc0] sm:$0xff]  }
  0x4e   : > { %3986 = vmatprep.subr.bf16.mxu0 %v4345_v6  ;;  %4277 = vmatprep.subr.bf16.mxu1 %v4345_v6  ;;  %v4411_v56 = vld [vmem:[%s4758_s19 + $0x2d8] sm:$0xff]   ;;  %v4414_v57 = vld [vmem:[%s4758_s19 + $0x2e0] sm:$0xff]   ;;  %v4381_v58 = vld [vmem:[%s4758_s19 + $0xc8] sm:$0xff]  }
  0x4f   : > { %v4384_v59 = vld [vmem:[%s4758_s19 + $0xd0] sm:$0xff]   ;;  %v4415_v60 = vld [vmem:[%s4758_s19 + $0x2e8] sm:$0xff]   ;;  %v4385_v62 = vld [vmem:[%s4758_s19 + $0xd8] sm:$0xff]  }
  0x50   : > { %v4418_v61 = vld [vmem:[%s4758_s19 + $0x2f0] sm:$0xff]   ;;  %v4419_v63 = vld [vmem:[%s4758_s19 + $0x2f8] sm:$0xff]   ;;  %v4388_v0 = vld [vmem:[%s4758_s19 + $0xe0] sm:$0xff]  }
  0x51   : > { %3987 = vmatpush3.bf16.msra.mxu0 %v4345_v6  ;;  %4285 = vmatpush3.bf16.msra.mxu1 %v4345_v6  ;;  %v4422_v1 = vld [vmem:[%s4758_s19 + $0x300] sm:$0xff]   ;;  %v4389_v2 = vld [vmem:[%s4758_s19 + $0xe8] sm:$0xff]   ;;  %v4392_v4 = vld [vmem:[%s4758_s19 + $0xf0] sm:$0xff]  }
  0x52   : > { %3988 = vmatprep.subr.bf16.mxu0 %v4346_v7  ;;  %4278 = vmatprep.subr.bf16.mxu1 %v4346_v7  ;;  %v4423_v3 = vld [vmem:[%s4758_s19 + $0x308] sm:$0xff]   ;;  %v4426_v5 = vld [vmem:[%s4758_s19 + $0x310] sm:$0xff]   ;;  %v4393_v6 = vld [vmem:[%s4758_s19 + $0xf8] sm:$0xff]  }
  0x53   : > { %v4430_v9 = vld [vmem:[%s4758_s19 + $0x320] sm:$0xff]  }
  0x55   : > { %3989 = vmatpush3.bf16.msra.mxu0 %v4346_v7  ;;  %4286 = vmatpush3.bf16.msra.mxu1 %v4346_v7  ;;  %v4427_v7 = vld [vmem:[%s4758_s19 + $0x318] sm:$0xff]  }
  0x56   : > { %3990 = vmatprep.subr.bf16.mxu0 %v4347_v8  ;;  %4279 = vmatprep.subr.bf16.mxu1 %v4347_v8 }
  0x59   : > { %3991 = vmatpush3.bf16.msra.mxu0 %v4347_v8  ;;  %4287 = vmatpush3.bf16.msra.mxu1 %v4347_v8  ;;  %v4396_v8 = vld [vmem:[%s4758_s19 + $0x100] sm:$0xff]  }
  0x5c   : > { %3993 = vmatmul.mubr.bf16.vlgmr.msra.gmra.mrb[0].mxu0 %v4349_v10  ;;  %4129 = vmatmul.mubr.bf16.vlgmr.msra.gmra.mrb[0].mxu1 %v4367_v12  ;;  %v4397_v10 = vld [vmem:[%s4758_s19 + $0x108] sm:$0xff]   ;;  %v4400_v12 = vld [vmem:[%s4758_s19 + $0x110] sm:$0xff]  }
  0x5d   : > { %3996 = vmatprep.mubr.bf16.mxu0 %v4350_v11  ;;  %4132 = vmatprep.mubr.bf16.mxu1 %v4370_v13  ;;  %v4431_v11 = vld [vmem:[%s4758_s19 + $0x328] sm:$0xff]   ;;  %v4434_v13 = vld [vmem:[%s4758_s19 + $0x330] sm:$0xff]  }
  0x64   : > { %3997 = vmatmul.mubr.bf16.gmra.mrb[4].mxu0 %v4351_v14  ;;  %4133 = vmatmul.mubr.bf16.gmra.mrb[4].mxu1 %v4371_v16  ;;  %v4401_v14 = vld [vmem:[%s4758_s19 + $0x118] sm:$0xff]   ;;  %v4404_v16 = vld [vmem:[%s4758_s19 + $0x120] sm:$0xff]  }
  0x65   : > { %4000 = vmatprep.mubr.bf16.mxu0 %v4352_v15  ;;  %4136 = vmatprep.mubr.bf16.mxu1 %v4374_v17  ;;  %v4435_v15 = vld [vmem:[%s4758_s19 + $0x338] sm:$0xff]   ;;  %v4438_v17 = vld [vmem:[%s4758_s19 + $0x340] sm:$0xff]  }
  0x6c   : > { %4001 = vmatmul.mubr.bf16.gmra.mrb[8].mxu0 %v4353_v18  ;;  %4137 = vmatmul.mubr.bf16.gmra.mrb[8].mxu1 %v4375_v20  ;;  %v4405_v18 = vld [vmem:[%s4758_s19 + $0x128] sm:$0xff]   ;;  %v4408_v20 = vld [vmem:[%s4758_s19 + $0x130] sm:$0xff]  }
  0x6d   : > { %4004 = vmatprep.mubr.bf16.mxu0 %v4354_v19  ;;  %4140 = vmatprep.mubr.bf16.mxu1 %v4378_v21  ;;  %v4439_v19 = vld [vmem:[%s4758_s19 + $0x348] sm:$0xff]   ;;  %v4442_v21 = vld [vmem:[%s4758_s19 + $0x350] sm:$0xff]  }
  0x74   : > { %4005 = vmatmul.mubr.bf16.gmra.mrb[12].mxu0 %v4355_v22  ;;  %4141 = vmatmul.mubr.bf16.gmra.mrb[12].mxu1 %v4379_v24  ;;  %v4409_v22 = vld [vmem:[%s4758_s19 + $0x138] sm:$0xff]   ;;  %v4412_v24 = vld [vmem:[%s4758_s19 + $0x140] sm:$0xff]  }
  0x75   : > { %4008 = vmatprep.mubr.bf16.mxu0 %v4356_v23  ;;  %4144 = vmatprep.mubr.bf16.mxu1 %v4382_v25  ;;  %v4443_v23 = vld [vmem:[%s4758_s19 + $0x358] sm:$0xff]   ;;  %v4446_v25 = vld [vmem:[%s4758_s19 + $0x360] sm:$0xff]  }
  0x7c   : > { %4009 = vmatmul.mubr.bf16.gmra.mrb[16].mxu0 %v4357_v26  ;;  %4145 = vmatmul.mubr.bf16.gmra.mrb[16].mxu1 %v4383_v28  ;;  %v4413_v26 = vld [vmem:[%s4758_s19 + $0x148] sm:$0xff]   ;;  %v4416_v28 = vld [vmem:[%s4758_s19 + $0x150] sm:$0xff]  }
  0x7d   : > { %4012 = vmatprep.mubr.bf16.mxu0 %v4358_v27  ;;  %4148 = vmatprep.mubr.bf16.mxu1 %v4386_v29  ;;  %v4447_v27 = vld [vmem:[%s4758_s19 + $0x368] sm:$0xff]   ;;  %v4450_v29 = vld [vmem:[%s4758_s19 + $0x370] sm:$0xff]  }
  0x84   : > { %4013 = vmatmul.mubr.bf16.gmra.mrb[20].mxu0 %v4359_v30  ;;  %4149 = vmatmul.mubr.bf16.gmra.mrb[20].mxu1 %v4387_v32  ;;  %v4417_v30 = vld [vmem:[%s4758_s19 + $0x158] sm:$0xff]   ;;  %v4420_v32 = vld [vmem:[%s4758_s19 + $0x160] sm:$0xff]  }
  0x85   : > { %4016 = vmatprep.mubr.bf16.mxu0 %v4360_v31  ;;  %4152 = vmatprep.mubr.bf16.mxu1 %v4390_v33  ;;  %v4451_v31 = vld [vmem:[%s4758_s19 + $0x378] sm:$0xff]   ;;  %v4454_v33 = vld [vmem:[%s4758_s19 + $0x380] sm:$0xff]  }
  0x8c   : > { %4017 = vmatmul.mubr.bf16.gmra.mrb[24].mxu0 %v4361_v34  ;;  %4153 = vmatmul.mubr.bf16.gmra.mrb[24].mxu1 %v4391_v36  ;;  %v4421_v34 = vld [vmem:[%s4758_s19 + $0x168] sm:$0xff]   ;;  %v4424_v36 = vld [vmem:[%s4758_s19 + $0x170] sm:$0xff]  }
  0x8d   : > { %4020 = vmatprep.mubr.bf16.mxu0 %v4362_v35  ;;  %4156 = vmatprep.mubr.bf16.mxu1 %v4394_v37  ;;  %v4455_v35 = vld [vmem:[%s4758_s19 + $0x388] sm:$0xff]   ;;  %v4458_v37 = vld [vmem:[%s4758_s19 + $0x390] sm:$0xff]  }
  0x94   : > { %4021 = vmatmul.mubr.bf16.gmra.mrb[28].mxu0 %v4363_v38  ;;  %4157 = vmatmul.mubr.bf16.gmra.mrb[28].mxu1 %v4395_v39  ;;  %v4425_v38 = vld [vmem:[%s4758_s19 + $0x178] sm:$0xff]  }
  0x95   : > { %4024 = vmatprep.mubr.bf16.mxu0 %v4364_v40  ;;  %4160 = vmatprep.mubr.bf16.mxu1 %v4398_v41  ;;  %v4459_v39 = vld [vmem:[%s4758_s19 + $0x398] sm:$0xff]   ;;  %v4428_v40 = vld [vmem:[%s4758_s19 + $0x180] sm:$0xff]  }
  0x96   : > { %v4462_v41 = vld [vmem:[%s4758_s19 + $0x3a0] sm:$0xff]  }
  0x9c   : > { %4025 = vmatmul.mubr.bf16.gmra.mrb[32].mxu0 %v4365_v42  ;;  %4161 = vmatmul.mubr.bf16.gmra.mrb[32].mxu1 %v4399_v43  ;;  %v4429_v42 = vld [vmem:[%s4758_s19 + $0x188] sm:$0xff]  }
  0x9d   : > { %4028 = vmatprep.mubr.bf16.mxu0 %v4368_v44  ;;  %4164 = vmatprep.mubr.bf16.mxu1 %v4402_v45  ;;  %v4463_v43 = vld [vmem:[%s4758_s19 + $0x3a8] sm:$0xff]   ;;  %v4432_v44 = vld [vmem:[%s4758_s19 + $0x190] sm:$0xff]  }
  0x9e   : > { %v4466_v45 = vld [vmem:[%s4758_s19 + $0x3b0] sm:$0xff]  }
  0xa4   : > { %4029 = vmatmul.mubr.bf16.gmra.mrb[36].mxu0 %v4369_v46  ;;  %4165 = vmatmul.mubr.bf16.gmra.mrb[36].mxu1 %v4403_v47  ;;  %v4433_v46 = vld [vmem:[%s4758_s19 + $0x198] sm:$0xff]  }
  0xa5   : > { %4032 = vmatprep.mubr.bf16.mxu0 %v4372_v48  ;;  %4168 = vmatprep.mubr.bf16.mxu1 %v4406_v49  ;;  %v4467_v47 = vld [vmem:[%s4758_s19 + $0x3b8] sm:$0xff]   ;;  %v4436_v48 = vld [vmem:[%s4758_s19 + $0x1a0] sm:$0xff]  }
  0xa6   : > { %v4468_v49 = vld [vmem:[%s4758_s19 + $0x3c0] sm:$0xff]  }
  0xac   : > { %4033 = vmatmul.mubr.bf16.gmra.mrb[40].mxu0 %v4373_v50  ;;  %4169 = vmatmul.mubr.bf16.gmra.mrb[40].mxu1 %v4407_v51  ;;  %v4476_v50 = vld [vmem:[%s5805_s3] sm:$0xff]   ;;  %v5813_v51 = vmov 0.0  }
  0xad   : > { %4036 = vmatprep.mubr.bf16.mxu0 %v4376_v52  ;;  %4172 = vmatprep.mubr.bf16.mxu1 %v4410_v53  ;;  %v4437_v52 = vld [vmem:[%s4758_s19 + $0x1a8] sm:$0xff]  }
  0xae   : > { %4248 = vmatprep.subr.bf16.mxu1 %v5813_v51  ;;  %v4469_v53 = vld [vmem:[%s4758_s19 + $0x3c8] sm:$0xff]  }
  0xaf   : > { %4249 = vmatpush3.bf16.msra.mxu1 %v4476_v50 }
  0xb0   : > { %4250 = vmatprep.subr.bf16.mxu1 %v5813_v51 }
  0xb4   : > { %4037 = vmatmul.mubr.bf16.gmra.mrb[44].mxu0 %v4377_v54  ;;  %4173 = vmatmul.mubr.bf16.gmra.mrb[44].mxu1 %v4411_v56  ;;  %v4440_v54 = vld [vmem:[%s4758_s19 + $0x1b0] sm:$0xff]   ;;  %v4906_v56 = vld [vmem:[%s5804_s2] ss:$0 sm:$0xff] }
  0xb5   : > { %4040 = vmatprep.mubr.bf16.mxu0 %v4380_v55  ;;  %4176 = vmatprep.mubr.bf16.mxu1 %v4414_v57  ;;  %v4470_v55 = vld [vmem:[%s4758_s19 + $0x3d0] sm:$0xff]  }
  0xbc   : > { %4041 = vmatmul.mubr.bf16.gmra.mrb[48].mxu0 %v4381_v58  ;;  %4177 = vmatmul.mubr.bf16.gmra.mrb[48].mxu1 %v4415_v60  ;;  %v4441_v60 = vld [vmem:[%s4758_s19 + $0x1b8] sm:$0xff]  }
  0xbd   : > { %4044 = vmatprep.mubr.bf16.mxu0 %v4384_v59  ;;  %4180 = vmatprep.mubr.bf16.mxu1 %v4418_v61  ;;  %v4471_v61 = vld [vmem:[%s4758_s19 + $0x3d8] sm:$0xff]  }
  0xc4   : > { %4045 = vmatmul.mubr.bf16.gmra.mrb[52].mxu0 %v4385_v62  ;;  %4181 = vmatmul.mubr.bf16.gmra.mrb[52].mxu1 %v4419_v63 }
  0xc5   : > { %4048 = vmatprep.mubr.bf16.mxu0 %v4388_v0  ;;  %4184 = vmatprep.mubr.bf16.mxu1 %v4422_v1 }
  0xcc   : > { %4049 = vmatmul.mubr.bf16.gmra.mrb[56].mxu0 %v4389_v2  ;;  %4185 = vmatmul.mubr.bf16.gmra.mrb[56].mxu1 %v4423_v3  ;;  %v4444_v2 = vld [vmem:[%s4758_s19 + $0x1c0] sm:$0xff]  }
  0xcd   : > { %4052 = vmatprep.mubr.bf16.mxu0 %v4392_v4  ;;  %4188 = vmatprep.mubr.bf16.mxu1 %v4426_v5  ;;  %v4472_v4 = vld [vmem:[%s4758_s19 + $0x3e0] sm:$0xff]  }
  0xd4   : > { %4053 = vmatmul.mubr.bf16.gmra.mrb[60].mxu0 %v4393_v6  ;;  %4189 = vmatmul.mubr.bf16.gmra.mrb[60].mxu1 %v4427_v7 }
  0xd5   : > { %4056 = vmatprep.mubr.bf16.mxu0 %v4396_v8  ;;  %4192 = vmatprep.mubr.bf16.mxu1 %v4430_v9 }
  0xdc   : > { %4057 = vmatmul.mubr.bf16.gmra.mrb[64].mxu0 %v4397_v10  ;;  %4193 = vmatmul.mubr.bf16.gmra.mrb[64].mxu1 %v4431_v11 }
  0xdd   : > { %4060 = vmatprep.mubr.bf16.mxu0 %v4400_v12  ;;  %4196 = vmatprep.mubr.bf16.mxu1 %v4434_v13 }
  0xe4   : > { %4061 = vmatmul.mubr.bf16.gmra.mrb[68].mxu0 %v4401_v14  ;;  %4197 = vmatmul.mubr.bf16.gmra.mrb[68].mxu1 %v4435_v15 }
  0xe5   : > { %4064 = vmatprep.mubr.bf16.mxu0 %v4404_v16  ;;  %4200 = vmatprep.mubr.bf16.mxu1 %v4438_v17 }
  0xec   : > { %4065 = vmatmul.mubr.bf16.gmra.mrb[72].mxu0 %v4405_v18  ;;  %4201 = vmatmul.mubr.bf16.gmra.mrb[72].mxu1 %v4439_v19  ;;  %v4445_v19 = vld [vmem:[%s4758_s19 + $0x1c8] sm:$0xff]  }
  0xed   : > { %4068 = vmatprep.mubr.bf16.mxu0 %v4408_v20  ;;  %4204 = vmatprep.mubr.bf16.mxu1 %v4442_v21  ;;  %v4473_v20 = vld [vmem:[%s4758_s19 + $0x3e8] sm:$0xff]  }
  0xf4   : > { %4069 = vmatmul.mubr.bf16.gmra.mrb[76].mxu0 %v4409_v22  ;;  %4205 = vmatmul.mubr.bf16.gmra.mrb[76].mxu1 %v4443_v23 }
  0xf5   : > { %4072 = vmatprep.mubr.bf16.mxu0 %v4412_v24  ;;  %4208 = vmatprep.mubr.bf16.mxu1 %v4446_v25 }
  0xfc   : > { %4073 = vmatmul.mubr.bf16.gmra.mrb[80].mxu0 %v4413_v26  ;;  %4209 = vmatmul.mubr.bf16.gmra.mrb[80].mxu1 %v4447_v27  ;;  %v4448_v26 = vld [vmem:[%s4758_s19 + $0x1d0] sm:$0xff]  }
  0xfd   : > { %4076 = vmatprep.mubr.bf16.mxu0 %v4416_v28  ;;  %4212 = vmatprep.mubr.bf16.mxu1 %v4450_v29  ;;  %v4474_v28 = vld [vmem:[%s4758_s19 + $0x3f0] sm:$0xff]  }
 0x104   : > { %4077 = vmatmul.mubr.bf16.gmra.mrb[84].mxu0 %v4417_v30  ;;  %4213 = vmatmul.mubr.bf16.gmra.mrb[84].mxu1 %v4451_v31 }
 0x105   : > { %4080 = vmatprep.mubr.bf16.mxu0 %v4420_v32  ;;  %4216 = vmatprep.mubr.bf16.mxu1 %v4454_v33 }
 0x10c   : > { %4081 = vmatmul.mubr.bf16.gmra.mrb[88].mxu0 %v4421_v34  ;;  %4217 = vmatmul.mubr.bf16.gmra.mrb[88].mxu1 %v4455_v35 }
 0x10d   : > { %4084 = vmatprep.mubr.bf16.mxu0 %v4424_v36  ;;  %4220 = vmatprep.mubr.bf16.mxu1 %v4458_v37 }
 0x114   : > { %4085 = vmatmul.mubr.bf16.gmra.mrb[92].mxu0 %v4425_v38  ;;  %4221 = vmatmul.mubr.bf16.gmra.mrb[92].mxu1 %v4459_v39 }
 0x115   : > { %4088 = vmatprep.mubr.bf16.mxu0 %v4428_v40  ;;  %4224 = vmatprep.mubr.bf16.mxu1 %v4462_v41 }
 0x11c   : > { %4089 = vmatmul.mubr.bf16.gmra.mrb[96].mxu0 %v4429_v42  ;;  %4225 = vmatmul.mubr.bf16.gmra.mrb[96].mxu1 %v4463_v43 }
 0x11d   : > { %4092 = vmatprep.mubr.bf16.mxu0 %v4432_v44  ;;  %4228 = vmatprep.mubr.bf16.mxu1 %v4466_v45 }
 0x124   : > { %4093 = vmatmul.mubr.bf16.gmra.mrb[100].mxu0 %v4433_v46  ;;  %4229 = vmatmul.mubr.bf16.gmra.mrb[100].mxu1 %v4467_v47  ;;  %v4449_v47 = vld [vmem:[%s4758_s19 + $0x1d8] sm:$0xff]  }
 0x125   : > { %4096 = vmatprep.mubr.bf16.mxu0 %v4436_v48  ;;  %4232 = vmatprep.mubr.bf16.mxu1 %v4468_v49  ;;  %v4475_v48 = vld [vmem:[%s4758_s19 + $0x3f8] sm:$0xff]  }
 0x12c   : > { %4097 = vmatmul.mubr.bf16.gmra.mrb[104].mxu0 %v4437_v52  ;;  %4233 = vmatmul.mubr.bf16.gmra.mrb[104].mxu1 %v4469_v53 }
 0x12d   : > { %4100 = vmatprep.mubr.bf16.mxu0 %v4440_v54  ;;  %4236 = vmatprep.mubr.bf16.mxu1 %v4470_v55  ;;  %v4452_v55 = vld [vmem:[%s4758_s19 + $0x1e0] sm:$0xff]  }
 0x12f   : > { %v3994_v57 = vpop.f32.mrb[0].mxu0  ;;  %v4908_v58 = vpop.f32.mrb[0].mxu1 }
 0x130   : > { %v1483_v59 = vpop.f32.mrb[1].mxu0  ;;  %v4912_v62 = vpop.f32.mrb[1].mxu1  ;;  %v1492_v63 = vadd.f32 %v3994_v57, %v4906_v56 }
 0x131   : > { %v1484_v0 = vadd.f32 %v4906_v56, %v1483_v59  ;;  %v3995_v1 = vpop.f32.mrb[2].mxu0  ;;  %v4917_v3 = vpop.f32.mrb[2].mxu1 }
 0x132   : > { %v1486_v5 = vpop.f32.mrb[3].mxu0  ;;  %v4920_v6 = vpop.f32.mrb[3].mxu1  ;;  %v1495_v8 = vadd.f32 %v3995_v1, %v4906_v56  ;;  %v2508_v10 = vmax.f32 %v1492_v63, 0.0 }
 0x133   : > { %v2506_v7 = vmax.f32 %v1484_v0, 0.0  ;;  %v1487_v9 = vadd.f32 %v4906_v56, %v1486_v5 }
 0x134   : > { %4101 = vmatmul.mubr.bf16.gmra.mrb[108].mxu0 %v4441_v60  ;;  %4237 = vmatmul.mubr.bf16.gmra.mrb[108].mxu1 %v4471_v61  ;;  %v2509_v13 = vmax.f32 %v1495_v8, 0.0  ;;  %v2766_v22 = vsel %vm2762_vm0, %v2508_v10, 0.0 }
 0x135   : > { %v2507_v11 = vmax.f32 %v1487_v9, 0.0  ;;  %4104 = vmatprep.mubr.bf16.mxu0 %v4444_v2  ;;  %4240 = vmatprep.mubr.bf16.mxu1 %v4472_v4  ;;  %v2763_v12 = vsel %vm2762_vm0, %v2506_v7, 0.0 }
 0x136   : > { %v2768_v32 = vsel %vm2762_vm0, %v2509_v13, 0.0 }
 0x137   : > { %v2764_v14 = vsel %vm2762_vm0, %v2507_v11, 0.0  ;;  %v3998_v15 = vpop.f32.mrb[4].mxu0  ;;  %v4926_v16 = vpop.f32.mrb[4].mxu1 }
 0x138   : > { %v2765_v17 = vadd.f32 %v2764_v14, %v2763_v12  ;;  %v1499_v18 = vpop.f32.mrb[5].mxu0  ;;  %v4930_v21 = vpop.f32.mrb[5].mxu1  ;;  %v1508_v23 = vadd.f32 %v3998_v15, %v4906_v56 }
 0x139   : > { %v1500_v24 = vadd.f32 %v4906_v56, %v1499_v18  ;;  %v3999_v25 = vpop.f32.mrb[6].mxu0  ;;  %v4936_v27 = vpop.f32.mrb[6].mxu1 }
 0x13a   : > { %v2767_v29 = vadd.f32 %v2766_v22, %v2765_v17  ;;  %v1502_v30 = vpop.f32.mrb[7].mxu0  ;;  %v4939_v31 = vpop.f32.mrb[7].mxu1  ;;  %v1511_v34 = vadd.f32 %v3999_v25, %v4906_v56  ;;  %v2512_v37 = vmax.f32 %v1508_v23, 0.0  ;;  %v4453_v17 = vld [vmem:[%s4758_s19 + $0x1e8] sm:$0xff]  }
 0x13b   : > { %v2510_v33 = vmax.f32 %v1500_v24, 0.0  ;;  %v1503_v35 = vadd.f32 %v4906_v56, %v1502_v30  ;;  %v4456_v24 = vld [vmem:[%s4758_s19 + $0x1f0] sm:$0xff]  }
 0x13c   : > { %v2769_v36 = vadd.f32 %v2768_v32, %v2767_v29  ;;  %4105 = vmatmul.mubr.bf16.gmra.mrb[112].mxu0 %v4445_v19  ;;  %4241 = vmatmul.mubr.bf16.gmra.mrb[112].mxu1 %v4473_v20  ;;  %v2513_v41 = vmax.f32 %v1511_v34, 0.0  ;;  %v2774_v50 = vsel %vm2762_vm0, %v2512_v37, 0.0 }
 0x13d   : > { %v2770_v38 = vsel %vm2762_vm0, %v2510_v33, 0.0  ;;  %v2511_v39 = vmax.f32 %v1503_v35, 0.0  ;;  %4108 = vmatprep.mubr.bf16.mxu0 %v4448_v26  ;;  %4244 = vmatprep.mubr.bf16.mxu1 %v4474_v28 }
 0x13e   : > { %v2771_v40 = vadd.f32 %v2770_v38, %v2769_v36  ;;  %v2776_v63 = vsel %vm2762_vm0, %v2513_v41, 0.0 }
 0x13f   : > { %v2772_v42 = vsel %vm2762_vm0, %v2511_v39, 0.0  ;;  %v4002_v43 = vpop.f32.mrb[8].mxu0  ;;  %v4946_v44 = vpop.f32.mrb[8].mxu1 }
 0x140   : > { %v2773_v45 = vadd.f32 %v2772_v42, %v2771_v40  ;;  %v1515_v46 = vpop.f32.mrb[9].mxu0  ;;  %v4950_v49 = vpop.f32.mrb[9].mxu1  ;;  %v1524_v52 = vadd.f32 %v4002_v43, %v4906_v56 }
 0x141   : > { %v1516_v53 = vadd.f32 %v4906_v56, %v1515_v46  ;;  %v4003_v54 = vpop.f32.mrb[10].mxu0  ;;  %v4956_v57 = vpop.f32.mrb[10].mxu1 }
 0x142   : > { %v2775_v59 = vadd.f32 %v2774_v50, %v2773_v45  ;;  %v1518_v60 = vpop.f32.mrb[11].mxu0  ;;  %v4958_v61 = vpop.f32.mrb[11].mxu1  ;;  %v1527_v1 = vadd.f32 %v4003_v54, %v4906_v56  ;;  %v2516_v5 = vmax.f32 %v1524_v52, 0.0 }
 0x143   : > { %v2514_v0 = vmax.f32 %v1516_v53, 0.0  ;;  %v1519_v2 = vadd.f32 %v4906_v56, %v1518_v60 }
 0x144   : > { %v2777_v4 = vadd.f32 %v2776_v63, %v2775_v59  ;;  %4109 = vmatmul.mubr.bf16.gmra.mrb[116].mxu0 %v4449_v47  ;;  %4245 = vmatmul.mubr.bf16.gmra.mrb[116].mxu1 %v4475_v48  ;;  %v2517_v10 = vmax.f32 %v1527_v1, 0.0  ;;  %v2782_v19 = vsel %vm2762_vm0, %v2516_v5, 0.0  ;;  %v4457_v47 = vld [vmem:[%s4758_s19 + $0x1f8] sm:$0xff]  }
 0x145   : > { %v2778_v7 = vsel %vm2762_vm0, %v2514_v0, 0.0  ;;  %v2515_v8 = vmax.f32 %v1519_v2, 0.0  ;;  %4112 = vmatprep.mubr.bf16.mxu0 %v4452_v55  ;;  %v4460_v55 = vld [vmem:[%s4758_s19 + $0x200] sm:$0xff]  }
 0x146   : > { %v2779_v9 = vadd.f32 %v2778_v7, %v2777_v4  ;;  %v2784_v30 = vsel %vm2762_vm0, %v2517_v10, 0.0 }
 0x147   : > { %v2780_v11 = vsel %vm2762_vm0, %v2515_v8, 0.0  ;;  %v4006_v12 = vpop.f32.mrb[12].mxu0  ;;  %v4965_v13 = vpop.f32.mrb[12].mxu1 }
 0x148   : > { %v2781_v14 = vadd.f32 %v2780_v11, %v2779_v9  ;;  %v1531_v15 = vpop.f32.mrb[13].mxu0  ;;  %v4968_v18 = vpop.f32.mrb[13].mxu1  ;;  %v1540_v20 = vadd.f32 %v4006_v12, %v4906_v56 }
 0x149   : > { %v1532_v22 = vadd.f32 %v4906_v56, %v1531_v15  ;;  %v4007_v23 = vpop.f32.mrb[14].mxu0  ;;  %v4974_v25 = vpop.f32.mrb[14].mxu1 }
 0x14a   : > { %v2783_v26 = vadd.f32 %v2782_v19, %v2781_v14  ;;  %v1534_v28 = vpop.f32.mrb[15].mxu0  ;;  %v4976_v29 = vpop.f32.mrb[15].mxu1  ;;  %v1543_v33 = vadd.f32 %v4007_v23, %v4906_v56  ;;  %v2520_v36 = vmax.f32 %v1540_v20, 0.0  ;;  %v4461_v23 = vld [vmem:[%s4758_s19 + $0x208] sm:$0xff]  }
 0x14b   : > { %v2518_v32 = vmax.f32 %v1532_v22, 0.0  ;;  %v1535_v34 = vadd.f32 %v4906_v56, %v1534_v28 }
 0x14c   : > { %v2785_v35 = vadd.f32 %v2784_v30, %v2783_v26  ;;  %4113 = vmatmul.mubr.bf16.gmra.mrb[120].mxu0 %v4453_v17  ;;  %v2521_v40 = vmax.f32 %v1543_v33, 0.0  ;;  %v2790_v50 = vsel %vm2762_vm0, %v2520_v36, 0.0 }
 0x14d   : > { %v2786_v37 = vsel %vm2762_vm0, %v2518_v32, 0.0  ;;  %v2519_v38 = vmax.f32 %v1535_v34, 0.0  ;;  %4116 = vmatprep.mubr.bf16.mxu0 %v4456_v24  ;;  %v4464_v32 = vld [vmem:[%s4758_s19 + $0x210] sm:$0xff]  }
 0x14e   : > { %v2787_v39 = vadd.f32 %v2786_v37, %v2785_v35  ;;  %v2792_v1 = vsel %vm2762_vm0, %v2521_v40, 0.0 }
 0x14f   : > { %v2788_v41 = vsel %vm2762_vm0, %v2519_v38, 0.0  ;;  %v4010_v42 = vpop.f32.mrb[16].mxu0  ;;  %v4983_v43 = vpop.f32.mrb[16].mxu1 }
 0x150   : > { %v2789_v45 = vadd.f32 %v2788_v41, %v2787_v39  ;;  %v1547_v46 = vpop.f32.mrb[17].mxu0  ;;  %v4986_v48 = vpop.f32.mrb[17].mxu1  ;;  %v1556_v52 = vadd.f32 %v4010_v42, %v4906_v56 }
 0x151   : > { %v1548_v53 = vadd.f32 %v4906_v56, %v1547_v46  ;;  %v4011_v54 = vpop.f32.mrb[18].mxu0  ;;  %v4992_v59 = vpop.f32.mrb[18].mxu1 }
 0x152   : > { %v2791_v60 = vadd.f32 %v2790_v50, %v2789_v45  ;;  %v1550_v63 = vpop.f32.mrb[19].mxu0  ;;  %v4994_v0 = vpop.f32.mrb[19].mxu1  ;;  %v1559_v4 = vadd.f32 %v4011_v54, %v4906_v56  ;;  %v2524_v8 = vmax.f32 %v1556_v52, 0.0 }
 0x153   : > { %v2522_v2 = vmax.f32 %v1548_v53, 0.0  ;;  %v1551_v5 = vadd.f32 %v4906_v56, %v1550_v63 }
 0x154   : > { %v2793_v7 = vadd.f32 %v2792_v1, %v2791_v60  ;;  %4117 = vmatmul.mubr.bf16.gmra.mrb[124].mxu0 %v4457_v47  ;;  %v2525_v12 = vmax.f32 %v1559_v4, 0.0  ;;  %v2798_v26 = vsel %vm2762_vm0, %v2524_v8, 0.0  ;;  %v4465_v1 = vld [vmem:[%s4758_s19 + $0x218] sm:$0xff]  }
 0x155   : > { %v2794_v9 = vsel %vm2762_vm0, %v2522_v2, 0.0  ;;  %v2523_v10 = vmax.f32 %v1551_v5, 0.0  ;;  %4120 = vmatprep.mubr.bf16.mxu0 %v4460_v55 }
 0x156   : > { %v2795_v11 = vadd.f32 %v2794_v9, %v2793_v7  ;;  %v2800_v37 = vsel %vm2762_vm0, %v2525_v12, 0.0 }
 0x157   : > { %v2796_v14 = vsel %vm2762_vm0, %v2523_v10, 0.0  ;;  %v4014_v15 = vpop.f32.mrb[20].mxu0  ;;  %v5001_v17 = vpop.f32.mrb[20].mxu1 }
 0x158   : > { %v2797_v19 = vadd.f32 %v2796_v14, %v2795_v11  ;;  %v1572_v20 = vadd.f32 %v4014_v15, %v4906_v56  ;;  %v1563_v22 = vpop.f32.mrb[21].mxu0  ;;  %v5005_v24 = vpop.f32.mrb[21].mxu1 }
 0x159   : > { %v1564_v28 = vadd.f32 %v4906_v56, %v1563_v22  ;;  %v4015_v30 = vpop.f32.mrb[22].mxu0  ;;  %v5010_v33 = vpop.f32.mrb[22].mxu1 }
 0x15a   : > { %5822 = vst [vmem:[#allocation8_spill] sm:$0xff] %v5010_v33  ;;  %v2799_v34 = vadd.f32 %v2798_v26, %v2797_v19  ;;  %v1566_v35 = vpop.f32.mrb[23].mxu0  ;;  %v5012_v36 = vpop.f32.mrb[23].mxu1  ;;  %v1575_v39 = vadd.f32 %v4015_v30, %v4906_v56  ;;  %v2528_v41 = vmax.f32 %v1572_v20, 0.0 }
 0x15b   : > { %v2526_v38 = vmax.f32 %v1564_v28, 0.0  ;;  %v1567_v40 = vadd.f32 %v4906_v56, %v1566_v35 }
 0x15c   : > { %v2801_v42 = vadd.f32 %v2800_v37, %v2799_v34  ;;  %4121 = vmatmul.mubr.bf16.gmra.mrb[128].mxu0 %v4461_v23  ;;  %v2529_v50 = vmax.f32 %v1575_v39, 0.0  ;;  %v2806_v55 = vsel %vm2762_vm0, %v2528_v41, 0.0 }
 0x15d   : > { %v2802_v45 = vsel %vm2762_vm0, %v2526_v38, 0.0  ;;  %v2527_v46 = vmax.f32 %v1567_v40, 0.0  ;;  %4124 = vmatprep.mubr.bf16.mxu0 %v4464_v32 }
 0x15e   : > { %v2803_v47 = vadd.f32 %v2802_v45, %v2801_v42  ;;  %v2808_v19 = vsel %vm2762_vm0, %v2529_v50, 0.0 }
 0x15f   : > { %v2804_v52 = vsel %vm2762_vm0, %v2527_v46, 0.0  ;;  %v4018_v53 = vpop.f32.mrb[24].mxu0  ;;  %v4154_v54 = vpop.f32.mrb[24].mxu1 }
 0x160   : > { %v2805_v60 = vadd.f32 %v2804_v52, %v2803_v47  ;;  %v1579_v63 = vpop.f32.mrb[25].mxu0  ;;  %v2123_v2 = vpop.f32.mrb[25].mxu1  ;;  %v1588_v4 = vadd.f32 %v4018_v53, %v4906_v56  ;;  %v2132_v8 = vadd.f32 %v4154_v54, %v4906_v56 }
 0x161   : > { %v1580_v5 = vadd.f32 %v4906_v56, %v1579_v63  ;;  %v4019_v7 = vpop.f32.mrb[26].mxu0  ;;  %v2124_v9 = vadd.f32 %v4906_v56, %v2123_v2  ;;  %v4155_v10 = vpop.f32.mrb[26].mxu1 }
 0x162   : > { %v2807_v11 = vadd.f32 %v2806_v55, %v2805_v60  ;;  %v1591_v12 = vadd.f32 %v4019_v7, %v4906_v56  ;;  %v1582_v14 = vpop.f32.mrb[27].mxu0  ;;  %v2126_v15 = vpop.f32.mrb[27].mxu1  ;;  %v2135_v28 = vadd.f32 %v4155_v10, %v4906_v56  ;;  %v2532_v30 = vmax.f32 %v1588_v4, 0.0 }
 0x163   : > { %v2530_v20 = vmax.f32 %v1580_v5, 0.0  ;;  %v1583_v22 = vadd.f32 %v4906_v56, %v1582_v14  ;;  %v2666_v23 = vmax.f32 %v2124_v9, 0.0  ;;  %v2668_v35 = vmax.f32 %v2132_v8, 0.0 }
 0x164   : > { %v2809_v26 = vadd.f32 %v2808_v19, %v2807_v11  ;;  %4125 = vmatmul.mubr.bf16.gmra.mrb[132].mxu0 %v4465_v1  ;;  %v2533_v38 = vmax.f32 %v1591_v12, 0.0  ;;  %v2127_v39 = vadd.f32 %v4906_v56, %v2126_v15  ;;  %v2669_v52 = vmax.f32 %v2135_v28, 0.0 }
 0x165   : > { %v2810_v32 = vsel %vm2762_vm0, %v2530_v20, 0.0  ;;  %v2531_v34 = vmax.f32 %v1583_v22, 0.0  ;;  %v3108_v42 = vsel %vm2762_vm0, %v2666_v23, 0.0  ;;  %v2814_v55 = vsel %vm2762_vm0, %v2532_v30, 0.0 }
 0x166   : > { %v2811_v37 = vadd.f32 %v2810_v32, %v2809_v26  ;;  %v2667_v53 = vmax.f32 %v2127_v39, 0.0  ;;  %v3111_v1 = vsel %vm2762_vm0, %v2668_v35, 0.0  ;;  %v2816_v5 = vsel %vm2762_vm0, %v2533_v38, 0.0 }
 0x167   : > { %v2812_v40 = vsel %vm2762_vm0, %v2531_v34, 0.0  ;;  %v4022_v41 = vpop.f32.mrb[28].mxu0  ;;  %v4158_v45 = vpop.f32.mrb[28].mxu1  ;;  %v3113_v23 = vsel %vm2762_vm0, %v2669_v52, 0.0 }
 0x168   : > { %v2813_v46 = vadd.f32 %v2812_v40, %v2811_v37  ;;  %v1604_v47 = vadd.f32 %v4022_v41, %v4906_v56  ;;  %v1595_v50 = vpop.f32.mrb[29].mxu0  ;;  %v2139_v54 = vpop.f32.mrb[29].mxu1  ;;  %v3109_v9 = vsel %vm2762_vm0, %v2667_v53, 0.0  ;;  %v2148_v10 = vadd.f32 %v4158_v45, %v4906_v56 }
 0x169   : > { %v1596_v60 = vadd.f32 %v4906_v56, %v1595_v50  ;;  %v4023_v63 = vpop.f32.mrb[30].mxu0  ;;  %v2140_v2 = vadd.f32 %v4906_v56, %v2139_v54  ;;  %v4159_v4 = vpop.f32.mrb[30].mxu1  ;;  %v3110_v19 = vadd.f32 %v3109_v9, %v3108_v42 }
 0x16a   : > { %v2815_v7 = vadd.f32 %v2814_v55, %v2813_v46  ;;  %v1598_v8 = vpop.f32.mrb[31].mxu0  ;;  %v2142_v11 = vpop.f32.mrb[31].mxu1  ;;  %v1607_v14 = vadd.f32 %v4023_v63, %v4906_v56  ;;  %v2536_v20 = vmax.f32 %v1604_v47, 0.0  ;;  %v2672_v35 = vmax.f32 %v2148_v10, 0.0 }
 0x16b   : > { %v2534_v12 = vmax.f32 %v1596_v60, 0.0  ;;  %v1599_v15 = vadd.f32 %v4906_v56, %v1598_v8  ;;  %v2670_v26 = vmax.f32 %v2140_v2, 0.0  ;;  %v3112_v32 = vadd.f32 %v3111_v1, %v3110_v19 }
 0x16c   : > { %v2817_v22 = vadd.f32 %v2816_v5, %v2815_v7  ;;  %v2151_v38 = vadd.f32 %v4159_v4, %v4906_v56  ;;  %v2537_v39 = vmax.f32 %v1607_v14, 0.0  ;;  %v2143_v45 = vadd.f32 %v4906_v56, %v2142_v11 }
 0x16d   : > { %v2818_v28 = vsel %vm2762_vm0, %v2534_v12, 0.0  ;;  %v2535_v30 = vmax.f32 %v1599_v15, 0.0  ;;  %v3115_v37 = vsel %vm2762_vm0, %v2670_v26, 0.0  ;;  %v3114_v42 = vadd.f32 %v3113_v23, %v3112_v32 }
 0x16e   : > { %v2819_v34 = vadd.f32 %v2818_v28, %v2817_v22  ;;  %v2822_v47 = vsel %vm2762_vm0, %v2536_v20, 0.0  ;;  %v2673_v54 = vmax.f32 %v2151_v38, 0.0  ;;  %v2671_v2 = vmax.f32 %v2143_v45, 0.0 }
 0x16f   : > { %v2820_v40 = vsel %vm2762_vm0, %v2535_v30, 0.0  ;;  %v4026_v41 = vpop.f32.mrb[32].mxu0  ;;  %v4162_v46 = vpop.f32.mrb[32].mxu1  ;;  %v3116_v1 = vadd.f32 %v3115_v37, %v3114_v42  ;;  %v3119_v10 = vsel %vm2762_vm0, %v2672_v35, 0.0  ;;  %v2824_v14 = vsel %vm2762_vm0, %v2537_v39, 0.0 }
 0x170   : > { %v2821_v50 = vadd.f32 %v2820_v40, %v2819_v34  ;;  %v1620_v52 = vadd.f32 %v4026_v41, %v4906_v56  ;;  %v1611_v53 = vpop.f32.mrb[33].mxu0  ;;  %v2155_v55 = vpop.f32.mrb[33].mxu1  ;;  %v2164_v11 = vadd.f32 %v4162_v46, %v4906_v56  ;;  %v3117_v20 = vsel %vm2762_vm0, %v2671_v2, 0.0 }
 0x171   : > { %v1612_v60 = vadd.f32 %v4906_v56, %v1611_v53  ;;  %v4027_v63 = vpop.f32.mrb[34].mxu0  ;;  %v2156_v4 = vadd.f32 %v4906_v56, %v2155_v55  ;;  %v4163_v5 = vpop.f32.mrb[34].mxu1  ;;  %v3118_v26 = vadd.f32 %v3117_v20, %v3116_v1  ;;  %v3121_v32 = vsel %vm2762_vm0, %v2673_v54, 0.0 }
 0x172   : > { %v2823_v7 = vadd.f32 %v2822_v47, %v2821_v50  ;;  %v1623_v8 = vadd.f32 %v4027_v63, %v4906_v56  ;;  %v1614_v9 = vpop.f32.mrb[35].mxu0  ;;  %v2158_v12 = vpop.f32.mrb[35].mxu1  ;;  %v2540_v23 = vmax.f32 %v1620_v52, 0.0  ;;  %v2676_v38 = vmax.f32 %v2164_v11, 0.0 }
 0x173   : > { %v2538_v15 = vmax.f32 %v1612_v60, 0.0  ;;  %v1615_v19 = vadd.f32 %v4906_v56, %v1614_v9  ;;  %v2674_v34 = vmax.f32 %v2156_v4, 0.0  ;;  %v3120_v35 = vadd.f32 %v3119_v10, %v3118_v26 }
 0x174   : > { %v2825_v22 = vadd.f32 %v2824_v14, %v2823_v7  ;;  %v2541_v28 = vmax.f32 %v1623_v8, 0.0  ;;  %v2167_v40 = vadd.f32 %v4163_v5, %v4906_v56  ;;  %v2159_v46 = vadd.f32 %v4906_v56, %v2158_v12 }
 0x175   : > { %v2539_v30 = vmax.f32 %v1615_v19, 0.0  ;;  %v2832_v39 = vsel %vm2762_vm0, %v2538_v15, 0.0  ;;  %v3123_v45 = vsel %vm2762_vm0, %v2674_v34, 0.0  ;;  %v3122_v55 = vadd.f32 %v3121_v32, %v3120_v35 }
 0x176   : > { %v2826_v37 = vrot.slane %v2825_v22, 4  ;;  %v2835_v63 = vsel %vm2762_vm0, %v2540_v23, 0.0  ;;  %v2837_v1 = vsel %vm2762_vm0, %v2541_v28, 0.0  ;;  %v2675_v5 = vmax.f32 %v2159_v46, 0.0 }
 0x177   : > { %v2833_v41 = vsel %vm2762_vm0, %v2539_v30, 0.0  ;;  %v4030_v42 = vpop.f32.mrb[36].mxu0  ;;  %v4166_v47 = vpop.f32.mrb[36].mxu1  ;;  %v2677_v12 = vmax.f32 %v2167_v40, 0.0  ;;  %v3127_v26 = vsel %vm2762_vm0, %v2676_v38, 0.0 }
 0x178   : > { %v2827_v50 = vadd.f32 %v2826_v37, %v2825_v22  ;;  %v2834_v52 = vadd.f32 %v2833_v41, %v2832_v39  ;;  %v1636_v53 = vadd.f32 %v4030_v42, %v4906_v56  ;;  %v1627_v54 = vpop.f32.mrb[37].mxu0  ;;  %v2171_v60 = vpop.f32.mrb[37].mxu1  ;;  %v3124_v22 = vadd.f32 %v3123_v45, %v3122_v55 }
 0x179   : > { %v1628_v2 = vadd.f32 %v4906_v56, %v1627_v54  ;;  %v4031_v4 = vpop.f32.mrb[38].mxu0  ;;  %v4167_v7 = vpop.f32.mrb[38].mxu1  ;;  %v2180_v28 = vadd.f32 %v4166_v47, %v4906_v56  ;;  %v3125_v37 = vsel %vm2762_vm0, %v2675_v5, 0.0  ;;  %v3129_v40 = vsel %vm2762_vm0, %v2677_v12, 0.0 }
 0x17a   : > { %v2828_v8 = vrot.slane %v2827_v50, 2  ;;  %v2836_v9 = vadd.f32 %v2835_v63, %v2834_v52  ;;  %v1639_v10 = vadd.f32 %v4031_v4, %v4906_v56  ;;  %v1630_v11 = vpop.f32.mrb[39].mxu0  ;;  %v2174_v14 = vpop.f32.mrb[39].mxu1  ;;  %v2544_v15 = vmax.f32 %v1636_v53, 0.0 }
 0x17b   : > { %v2542_v19 = vmax.f32 %v1628_v2, 0.0  ;;  %v1631_v20 = vadd.f32 %v4906_v56, %v1630_v11  ;;  %v3126_v39 = vadd.f32 %v3125_v37, %v3124_v22  ;;  %v2172_v38 = vadd.f32 %v4906_v56, %v2171_v60 }
 0x17c   : > { %v2838_v23 = vadd.f32 %v2837_v1, %v2836_v9  ;;  %v2545_v32 = vmax.f32 %v1639_v10, 0.0  ;;  %v5076_v41 = vadd.f32 %v2828_v8, %v2827_v50  ;;  %v2843_v42 = vsel %vm2762_vm0, %v2544_v15, 0.0 }
 0x17d   : > { %v2839_v30 = vsel %vm2762_vm0, %v2542_v19, 0.0  ;;  %v2543_v34 = vmax.f32 %v1631_v20, 0.0  ;;  %v3128_v55 = vadd.f32 %v3127_v26, %v3126_v39  ;;  %v2680_v63 = vmax.f32 %v2180_v28, 0.0 }
 0x17e   : > { %v2840_v35 = vadd.f32 %v2839_v30, %v2838_v23  ;;  %v2845_v2 = vsel %vm2762_vm0, %v2545_v32, 0.0  ;;  %v2678_v5 = vmax.f32 %v2172_v38, 0.0  ;;  %v2183_v8 = vadd.f32 %v4167_v7, %v4906_v56 }
 0x17f   : > { %v2841_v45 = vsel %vm2762_vm0, %v2543_v34, 0.0  ;;  %v4034_v46 = vpop.f32.mrb[40].mxu0  ;;  %v4170_v47 = vpop.f32.mrb[40].mxu1  ;;  %v2175_v15 = vadd.f32 %v4906_v56, %v2174_v14  ;;  %v3130_v23 = vadd.f32 %v3129_v40, %v3128_v55  ;;  %v2830_v28 = vrot.slane %v5076_v41, 1 }
 0x180   : > { %v2842_v52 = vadd.f32 %v2841_v45, %v2840_v35  ;;  %v1652_v53 = vadd.f32 %v4034_v46, %v4906_v56  ;;  %v1643_v54 = vpop.f32.mrb[41].mxu0  ;;  %v2187_v1 = vpop.f32.mrb[41].mxu1  ;;  %v3131_v26 = vsel %vm2762_vm0, %v2678_v5, 0.0  ;;  %v3135_v34 = vsel %vm2762_vm0, %v2680_v63, 0.0 }
 0x181   : > { %v1644_v50 = vadd.f32 %v4906_v56, %v1643_v54  ;;  %v4035_v4 = vpop.f32.mrb[42].mxu0  ;;  %v4171_v9 = vpop.f32.mrb[42].mxu1  ;;  %v3132_v37 = vadd.f32 %v3131_v26, %v3130_v23  ;;  %v2679_v14 = vmax.f32 %v2175_v15, 0.0  ;;  %v2196_v38 = vadd.f32 %v4170_v47, %v4906_v56 }
 0x182   : > { %v2844_v10 = vadd.f32 %v2843_v42, %v2842_v52  ;;  %v2548_v11 = vmax.f32 %v1652_v53, 0.0  ;;  %v1655_v60 = vadd.f32 %v4035_v4, %v4906_v56  ;;  %v1646_v12 = vpop.f32.mrb[43].mxu0  ;;  %v2190_v19 = vpop.f32.mrb[43].mxu1  ;;  %v2681_v42 = vmax.f32 %v2183_v8, 0.0 }
 0x183   : > { %v2546_v20 = vmax.f32 %v1644_v50, 0.0  ;;  %v1647_v22 = vadd.f32 %v4906_v56, %v1646_v12  ;;  %v2188_v52 = vadd.f32 %v4906_v56, %v2187_v1  ;;  %v3133_v63 = vsel %vm2762_vm0, %v2679_v14, 0.0 }
 0x184   : > { %v2846_v30 = vadd.f32 %v2845_v2, %v2844_v10  ;;  %v2549_v39 = vmax.f32 %v1655_v60, 0.0  ;;  %v2851_v45 = vsel %vm2762_vm0, %v2548_v11, 0.0  ;;  %v2199_v50 = vadd.f32 %v4171_v9, %v4906_v56 }
 0x185   : > { %v2847_v7 = vsel %vm2762_vm0, %v2546_v20, 0.0  ;;  %v2547_v32 = vmax.f32 %v1647_v22, 0.0  ;;  %v3134_v10 = vadd.f32 %v3133_v63, %v3132_v37  ;;  %v2682_v11 = vmax.f32 %v2188_v52, 0.0 }
 0x186   : > { %v2848_v35 = vadd.f32 %v2847_v7, %v2846_v30  ;;  %v2191_v60 = vadd.f32 %v4906_v56, %v2190_v19  ;;  %v2853_v1 = vsel %vm2762_vm0, %v2549_v39, 0.0  ;;  %v3137_v22 = vsel %vm2762_vm0, %v2681_v42, 0.0 }
 0x187   : > { %v2849_v46 = vsel %vm2762_vm0, %v2547_v32, 0.0  ;;  %v4038_v40 = vpop.f32.mrb[44].mxu0  ;;  %v4174_v53 = vpop.f32.mrb[44].mxu1  ;;  %v3136_v30 = vadd.f32 %v3135_v34, %v3134_v10  ;;  %v2684_v7 = vmax.f32 %v2196_v38, 0.0  ;;  %v2685_v19 = vmax.f32 %v2199_v50, 0.0 }
 0x188   : > { %v2850_v54 = vadd.f32 %v2849_v46, %v2848_v35  ;;  %v1668_v55 = vadd.f32 %v4038_v40, %v4906_v56  ;;  %v1659_v2 = vpop.f32.mrb[45].mxu0  ;;  %v2203_v4 = vpop.f32.mrb[45].mxu1  ;;  %v3139_v35 = vsel %vm2762_vm0, %v2682_v11, 0.0  ;;  %v2683_v46 = vmax.f32 %v2191_v60, 0.0 }
 0x189   : > { %v1660_v5 = vadd.f32 %v4906_v56, %v1659_v2  ;;  %v4039_v8 = vpop.f32.mrb[46].mxu0  ;;  %v4175_v47 = vpop.f32.mrb[46].mxu1  ;;  %v2212_v42 = vadd.f32 %v4174_v53, %v4906_v56  ;;  %v3143_v38 = vsel %vm2762_vm0, %v2684_v7, 0.0  ;;  %v3145_v7 = vsel %vm2762_vm0, %v2685_v19, 0.0 }
 0x18a   : > { %v2852_v12 = vadd.f32 %v2851_v45, %v2850_v54  ;;  %v1671_v15 = vadd.f32 %v4039_v8, %v4906_v56  ;;  %v1662_v20 = vpop.f32.mrb[47].mxu0  ;;  %v2206_v23 = vpop.f32.mrb[47].mxu1  ;;  %v2552_v32 = vmax.f32 %v1668_v55, 0.0  ;;  %v3138_v45 = vadd.f32 %v3137_v22, %v3136_v30 }
 0x18b   : > { %v2550_v26 = vmax.f32 %v1660_v5, 0.0  ;;  %v1663_v9 = vadd.f32 %v4906_v56, %v1662_v20  ;;  %v2204_v54 = vadd.f32 %v4906_v56, %v2203_v4  ;;  %v3141_v63 = vsel %vm2762_vm0, %v2683_v46, 0.0 }
 0x18c   : > { %v2854_v37 = vadd.f32 %v2853_v1, %v2852_v12  ;;  %v2553_v52 = vmax.f32 %v1671_v15, 0.0  ;;  %v3140_v55 = vadd.f32 %v3139_v35, %v3138_v45  ;;  %v2215_v60 = vadd.f32 %v4175_v47, %v4906_v56 }
 0x18d   : > { %v2855_v14 = vsel %vm2762_vm0, %v2550_v26, 0.0  ;;  %v2551_v39 = vmax.f32 %v1663_v9, 0.0  ;;  %v2686_v11 = vmax.f32 %v2204_v54, 0.0  ;;  %v2859_v53 = vsel %vm2762_vm0, %v2552_v32, 0.0 }
 0x18e   : > { %v2856_v40 = vadd.f32 %v2855_v14, %v2854_v37  ;;  %v3142_v15 = vadd.f32 %v3141_v63, %v3140_v55  ;;  %v2207_v20 = vadd.f32 %v4906_v56, %v2206_v23  ;;  %v2861_v26 = vsel %vm2762_vm0, %v2553_v52, 0.0 }
 0x18f   : > { %v2857_v2 = vsel %vm2762_vm0, %v2551_v39, 0.0  ;;  %v4042_v34 = vpop.f32.mrb[48].mxu0  ;;  %v4178_v50 = vpop.f32.mrb[48].mxu1  ;;  %v2688_v37 = vmax.f32 %v2212_v42, 0.0  ;;  %v2689_v23 = vmax.f32 %v2215_v60, 0.0 }
 0x190   : > { %v2858_v5 = vadd.f32 %v2857_v2, %v2856_v40  ;;  %v1684_v8 = vadd.f32 %v4042_v34, %v4906_v56  ;;  %v1675_v10 = vpop.f32.mrb[49].mxu0  ;;  %v2219_v1 = vpop.f32.mrb[49].mxu1  ;;  %v3144_v39 = vadd.f32 %v3143_v38, %v3142_v15  ;;  %v3147_v40 = vsel %vm2762_vm0, %v2686_v11, 0.0 }
 0x191   : > { %v1676_v4 = vadd.f32 %v4906_v56, %v1675_v10  ;;  %v4043_v12 = vpop.f32.mrb[50].mxu0  ;;  %v4179_v22 = vpop.f32.mrb[50].mxu1  ;;  %v2687_v34 = vmax.f32 %v2207_v20, 0.0  ;;  %v3151_v19 = vsel %vm2762_vm0, %v2688_v37, 0.0  ;;  %v2228_v42 = vadd.f32 %v4178_v50, %v4906_v56 }
 0x192   : > { %v2860_v9 = vadd.f32 %v2859_v53, %v2858_v5  ;;  %v1678_v30 = vpop.f32.mrb[51].mxu0  ;;  %v2222_v35 = vpop.f32.mrb[51].mxu1  ;;  %v1687_v47 = vadd.f32 %v4043_v12, %v4906_v56  ;;  %v2556_v45 = vmax.f32 %v1684_v8, 0.0  ;;  %v3146_v2 = vadd.f32 %v3145_v7, %v3144_v39 }
 0x193   : > { %v2554_v14 = vmax.f32 %v1676_v4, 0.0  ;;  %v1679_v32 = vadd.f32 %v4906_v56, %v1678_v30  ;;  %v2220_v63 = vadd.f32 %v4906_v56, %v2219_v1  ;;  %v3149_v11 = vsel %vm2762_vm0, %v2687_v34, 0.0 }
 0x194   : > { %v2862_v46 = vadd.f32 %v2861_v26, %v2860_v9  ;;  %v2557_v5 = vmax.f32 %v1687_v47, 0.0  ;;  %v3148_v10 = vadd.f32 %v3147_v40, %v3146_v2  ;;  %v2231_v20 = vadd.f32 %v4179_v22, %v4906_v56  ;;  %v4477_v22 = vld [vmem:[%s5805_s3 + $0x8] sm:$0xff]  }
 0x195   : > { %v2863_v54 = vsel %vm2762_vm0, %v2554_v14, 0.0  ;;  %v2555_v52 = vmax.f32 %v1679_v32, 0.0  ;;  %v2690_v15 = vmax.f32 %v2220_v63, 0.0  ;;  %v2867_v50 = vsel %vm2762_vm0, %v2556_v45, 0.0  ;;  %4251 = vmatpush3.bf16.msra.mxu1 %v4477_v22 }
 0x196   : > { %v2864_v55 = vadd.f32 %v2863_v54, %v2862_v46  ;;  %v3150_v30 = vadd.f32 %v3149_v11, %v3148_v10  ;;  %v2223_v7 = vadd.f32 %v4906_v56, %v2222_v35  ;;  %v3153_v39 = vsel %vm2762_vm0, %v2689_v23, 0.0  ;;  %4256 = vmatprep.subr.bf16.mxu1 %v5813_v51 }
 0x197   : > { %v2865_v38 = vsel %vm2762_vm0, %v2555_v52, 0.0  ;;  %v4046_v8 = vpop.f32.mrb[52].mxu0  ;;  %v4182_v60 = vpop.f32.mrb[52].mxu1  ;;  %v2692_v46 = vmax.f32 %v2228_v42, 0.0  ;;  %v2869_v45 = vsel %vm2762_vm0, %v2557_v5, 0.0  ;;  %v2693_v63 = vmax.f32 %v2231_v20, 0.0 }
 0x198   : > { %v2866_v53 = vadd.f32 %v2865_v38, %v2864_v55  ;;  %v1700_v4 = vadd.f32 %v4046_v8, %v4906_v56  ;;  %v1691_v12 = vpop.f32.mrb[53].mxu0  ;;  %v2235_v26 = vpop.f32.mrb[53].mxu1  ;;  %v3152_v2 = vadd.f32 %v3151_v19, %v3150_v30  ;;  %v3155_v55 = vsel %vm2762_vm0, %v2690_v15, 0.0 }
 0x199   : > { %v1692_v1 = vadd.f32 %v4906_v56, %v1691_v12  ;;  %v4047_v9 = vpop.f32.mrb[54].mxu0  ;;  %v4183_v37 = vpop.f32.mrb[54].mxu1  ;;  %v2691_v8 = vmax.f32 %v2223_v7, 0.0  ;;  %v3159_v5 = vsel %vm2762_vm0, %v2692_v46, 0.0  ;;  %v2244_v20 = vadd.f32 %v4182_v60, %v4906_v56 }
 0x19a   : > { %v2868_v14 = vadd.f32 %v2867_v50, %v2866_v53  ;;  %v1703_v47 = vadd.f32 %v4047_v9, %v4906_v56  ;;  %v1694_v32 = vpop.f32.mrb[55].mxu0  ;;  %v2238_v40 = vpop.f32.mrb[55].mxu1  ;;  %v2560_v35 = vmax.f32 %v1700_v4, 0.0  ;;  %v3154_v38 = vadd.f32 %v3153_v39, %v3152_v2 }
 0x19b   : > { %v2558_v54 = vmax.f32 %v1692_v1, 0.0  ;;  %v1695_v52 = vadd.f32 %v4906_v56, %v1694_v32  ;;  %v2236_v53 = vadd.f32 %v4906_v56, %v2235_v26  ;;  %v3157_v15 = vsel %vm2762_vm0, %v2691_v8, 0.0 }
 0x19c   : > { %v2870_v34 = vadd.f32 %v2869_v45, %v2868_v14  ;;  %v2561_v11 = vmax.f32 %v1703_v47, 0.0  ;;  %v3156_v12 = vadd.f32 %v3155_v55, %v3154_v38  ;;  %v2247_v14 = vadd.f32 %v4183_v37, %v4906_v56 }
 0x19d   : > { %v2871_v23 = vsel %vm2762_vm0, %v2558_v54, 0.0  ;;  %v2559_v42 = vmax.f32 %v1695_v52, 0.0  ;;  %v2694_v7 = vmax.f32 %v2236_v53, 0.0  ;;  %v2875_v32 = vsel %vm2762_vm0, %v2560_v35, 0.0 }
 0x19e   : > { %v2872_v10 = vadd.f32 %v2871_v23, %v2870_v34  ;;  %v3158_v46 = vadd.f32 %v3157_v15, %v3156_v12  ;;  %v2239_v22 = vadd.f32 %v4906_v56, %v2238_v40  ;;  %v2877_v60 = vsel %vm2762_vm0, %v2561_v11, 0.0 }
 0x19f   : > { %v2873_v19 = vsel %vm2762_vm0, %v2559_v42, 0.0  ;;  %v4050_v4 = vpop.f32.mrb[56].mxu0  ;;  %v4186_v50 = vpop.f32.mrb[56].mxu1  ;;  %v3161_v34 = vsel %vm2762_vm0, %v2693_v63, 0.0  ;;  %v2696_v42 = vmax.f32 %v2244_v20, 0.0  ;;  %v2697_v40 = vmax.f32 %v2247_v14, 0.0 }
 0x1a0   : > { %v2874_v1 = vadd.f32 %v2873_v19, %v2872_v10  ;;  %v1716_v9 = vadd.f32 %v4050_v4, %v4906_v56  ;;  %v1707_v30 = vpop.f32.mrb[57].mxu0  ;;  %v2251_v47 = vpop.f32.mrb[57].mxu1  ;;  %v3160_v35 = vadd.f32 %v3159_v5, %v3158_v46  ;;  %v3163_v10 = vsel %vm2762_vm0, %v2694_v7, 0.0  ;;  %v5162_v63 = vld [vmem:[%s5804_s2] ss:$0 sm:$0xff] }
 0x1a1   : > { %v1708_v26 = vadd.f32 %v4906_v56, %v1707_v30  ;;  %v4051_v39 = vpop.f32.mrb[58].mxu0  ;;  %v4187_v45 = vpop.f32.mrb[58].mxu1  ;;  %v2695_v4 = vmax.f32 %v2239_v22, 0.0  ;;  %v2252_v5 = vadd.f32 %v5162_v63, %v2251_v47 }
 0x1a2   : > { %v2876_v54 = vadd.f32 %v2875_v32, %v2874_v1  ;;  %v1719_v52 = vadd.f32 %v4051_v39, %v4906_v56  ;;  %v1710_v2 = vpop.f32.mrb[59].mxu0  ;;  %v2254_v55 = vpop.f32.mrb[59].mxu1  ;;  %v2564_v38 = vmax.f32 %v1716_v9, 0.0  ;;  %v3162_v19 = vadd.f32 %v3161_v34, %v3160_v35 }
 0x1a3   : > { %v2562_v37 = vmax.f32 %v1708_v26, 0.0  ;;  %v1711_v23 = vadd.f32 %v4906_v56, %v1710_v2  ;;  %v2260_v56 = vadd.f32 %v5162_v63, %v4186_v50  ;;  %v3167_v9 = vsel %vm2762_vm0, %v2696_v42, 0.0 }
 0x1a4   : > { %v2878_v8 = vadd.f32 %v2877_v60, %v2876_v54  ;;  %v2565_v15 = vmax.f32 %v1719_v52, 0.0  ;;  %v3164_v30 = vadd.f32 %v3163_v10, %v3162_v19  ;;  %v3165_v7 = vsel %vm2762_vm0, %v2695_v4, 0.0 }
 0x1a5   : > { %v2879_v53 = vsel %vm2762_vm0, %v2562_v37, 0.0  ;;  %v2563_v11 = vmax.f32 %v1711_v23, 0.0  ;;  %v2698_v46 = vmax.f32 %v2252_v5, 0.0  ;;  %v2263_v22 = vadd.f32 %v5162_v63, %v4187_v45 }
 0x1a6   : > { %v2880_v12 = vadd.f32 %v2879_v53, %v2878_v8  ;;  %v2883_v50 = vsel %vm2762_vm0, %v2564_v38, 0.0  ;;  %v3166_v52 = vadd.f32 %v3165_v7, %v3164_v30  ;;  %v2255_v2 = vadd.f32 %v5162_v63, %v2254_v55 }
 0x1a7   : > { %v2881_v20 = vsel %vm2762_vm0, %v2563_v11, 0.0  ;;  %v4054_v1 = vpop.f32.mrb[60].mxu0  ;;  %v4190_v14 = vpop.f32.mrb[60].mxu1  ;;  %v2885_v37 = vsel %vm2762_vm0, %v2565_v15, 0.0  ;;  %v3169_v42 = vsel %vm2762_vm0, %v2697_v40, 0.0  ;;  %v2700_v8 = vmax.f32 %v2260_v56, 0.0 }
 0x1a8   : > { %v2882_v32 = vadd.f32 %v2881_v20, %v2880_v12  ;;  %v1732_v26 = vadd.f32 %v5162_v63, %v4054_v1  ;;  %v1723_v39 = vpop.f32.mrb[61].mxu0  ;;  %v2267_v60 = vpop.f32.mrb[61].mxu1  ;;  %v3168_v11 = vadd.f32 %v3167_v9, %v3166_v52  ;;  %v3177_v12 = vsel %vm2762_vm0, %v2698_v46, 0.0 }
 0x1a9   : > { %v1724_v47 = vadd.f32 %v5162_v63, %v1723_v39  ;;  %v4055_v54 = vpop.f32.mrb[62].mxu0  ;;  %v4191_v34 = vpop.f32.mrb[62].mxu1  ;;  %v2701_v55 = vmax.f32 %v2263_v22, 0.0  ;;  %v2699_v1 = vmax.f32 %v2255_v2, 0.0  ;;  %v2831_v40 = vadd.f32 %v2830_v28, %v5076_v41 }
 0x1aa   : > { %v2884_v23 = vadd.f32 %v2883_v50, %v2882_v32  ;;  %v1726_v35 = vpop.f32.mrb[63].mxu0  ;;  %v2270_v10 = vpop.f32.mrb[63].mxu1  ;;  %v1735_v45 = vadd.f32 %v5162_v63, %v4055_v54  ;;  %v2568_v19 = vmax.f32 %v1732_v26, 0.0  ;;  %v5180_v20 = vadd.f32 %v3169_v42, %v3168_v11 }
 0x1ab   : > { %v2566_v53 = vmax.f32 %v1724_v47, 0.0  ;;  %v1727_v38 = vadd.f32 %v5162_v63, %v1726_v35  ;;  %v3180_v30 = vsel %vm2762_vm0, %v2700_v8, 0.0  ;;  %v2276_v9 = vadd.f32 %v5162_v63, %v4190_v14 }
 0x1ac   : > { %v2886_v4 = vadd.f32 %v2885_v37, %v2884_v23  ;;  %5823 = vst [vmem:[#allocation9_spill] sm:$0xff] %v5180_v20  ;;  %v2569_v7 = vmax.f32 %v1735_v45, 0.0  ;;  %v3178_v39 = vsel %vm2762_vm0, %v2699_v1, 0.0  ;;  %v2268_v46 = vadd.f32 %v5162_v63, %v2267_v60 }
 0x1ad   : > { %v2887_v5 = vsel %vm2762_vm0, %v2566_v53, 0.0  ;;  %v2567_v15 = vmax.f32 %v1727_v38, 0.0  ;;  %v2891_v50 = vsel %vm2762_vm0, %v2568_v19, 0.0  ;;  %v3179_v52 = vadd.f32 %v3178_v39, %v3177_v12 }
 0x1ae   : > { %v2888_v56 = vadd.f32 %v2887_v5, %v2886_v4  ;;  %v3182_v37 = vsel %vm2762_vm0, %v2701_v55, 0.0  ;;  %v2702_v23 = vmax.f32 %v2268_v46, 0.0  ;;  %v3315_v42 = vpack.c.bf16 %v2831_v40, %v2831_v40 }
 0x1af   : > { %v2889_v32 = vsel %vm2762_vm0, %v2567_v15, 0.0  ;;  %v4058_v26 = vpop.f32.mrb[64].mxu0  ;;  %v4194_v22 = vpop.f32.mrb[64].mxu1  ;;  %v3181_v53 = vadd.f32 %v3180_v30, %v3179_v52  ;;  %v2704_v45 = vmax.f32 %v2276_v9, 0.0  ;;  %v2893_v11 = vsel %vm2762_vm0, %v2569_v7, 0.0 }
 0x1b0   : > { %v2890_v47 = vadd.f32 %v2889_v32, %v2888_v56  ;;  %v1739_v54 = vpop.f32.mrb[65].mxu0  ;;  %v5191_v41 = vpop.f32.mrb[65].mxu1  ;;  %v1748_v28 = vadd.f32 %v5162_v63, %v4058_v26  ;;  %v2279_v55 = vadd.f32 %v5162_v63, %v4191_v34  ;;  %v3184_v40 = vsel %vm2762_vm0, %v2702_v23, 0.0 }
 0x1b1   : > { %v1740_v14 = vadd.f32 %v5162_v63, %v1739_v54  ;;  %v4059_v2 = vpop.f32.mrb[66].mxu0  ;;  %v5196_v35 = vpop.f32.mrb[66].mxu1  ;;  %v3183_v15 = vadd.f32 %v3182_v37, %v3181_v53  ;;  %v5205_v32 = vunpack.c.l.b16 %v3315_v42  ;;  %v3188_v9 = vsel %vm2762_vm0, %v2704_v45, 0.0 }
 0x1b2   : > { %v2892_v60 = vadd.f32 %v2891_v50, %v2890_v47  ;;  %v1742_v8 = vpop.f32.mrb[67].mxu0  ;;  %v5198_v38 = vpop.f32.mrb[67].mxu1  ;;  %v1751_v4 = vadd.f32 %v5162_v63, %v4059_v2  ;;  %v2572_v1 = vmax.f32 %v1748_v28, 0.0  ;;  %v2271_v47 = vadd.f32 %v5162_v63, %v2270_v10 }
 0x1b3   : > { %v2570_v19 = vmax.f32 %v1740_v14, 0.0  ;;  %v1743_v12 = vadd.f32 %v5162_v63, %v1742_v8  ;;  %v3185_v26 = vadd.f32 %v3184_v40, %v3183_v15  ;;  %v2705_v2 = vmax.f32 %v2279_v55, 0.0 }
 0x1b4   : > { %v2894_v5 = vadd.f32 %v2893_v11, %v2892_v60  ;;  %v2573_v39 = vmax.f32 %v1751_v4, 0.0  ;;  %v2904_v23 = vsel %vm2762_vm0, %v2572_v1, 0.0  ;;  %v2703_v8 = vmax.f32 %v2271_v47, 0.0 }
 0x1b5   : > { %v2571_v56 = vmax.f32 %v1743_v12, 0.0  ;;  %v2901_v7 = vsel %vm2762_vm0, %v2570_v19, 0.0  ;;  %v2292_v53 = vadd.f32 %v5162_v63, %v4194_v22 }
 0x1b6   : > { %v2895_v30 = vrot.slane %v2894_v5, 4  ;;  %v2906_v15 = vsel %vm2762_vm0, %v2573_v39, 0.0 }
 0x1b7   : > { %v2902_v46 = vsel %vm2762_vm0, %v2571_v56, 0.0  ;;  %v4062_v50 = vpop.f32.mrb[68].mxu0  ;;  %v5211_v54 = vpop.f32.mrb[68].mxu1  ;;  %v3186_v56 = vsel %vm2762_vm0, %v2703_v8, 0.0 }
 0x1b8   : > { %v2896_v34 = vadd.f32 %v2895_v30, %v2894_v5  ;;  %v2903_v52 = vadd.f32 %v2902_v46, %v2901_v7  ;;  %v1764_v28 = vadd.f32 %v5162_v63, %v4062_v50  ;;  %v1755_v14 = vpop.f32.mrb[69].mxu0  ;;  %v5214_v37 = vpop.f32.mrb[69].mxu1  ;;  %v3190_v7 = vsel %vm2762_vm0, %v2705_v2, 0.0 }
 0x1b9   : > { %v1756_v42 = vadd.f32 %v5162_v63, %v1755_v14  ;;  %v4063_v60 = vpop.f32.mrb[70].mxu0  ;;  %v5219_v45 = vpop.f32.mrb[70].mxu1  ;;  %v3187_v47 = vadd.f32 %v3186_v56, %v3185_v26  ;;  %v2295_v2 = vadd.f32 %v5162_v63, %v5196_v35 }
 0x1ba   : > { %v2897_v10 = vrot.slane %v2896_v34, 2  ;;  %v2905_v11 = vadd.f32 %v2904_v23, %v2903_v52  ;;  %v2576_v19 = vmax.f32 %v1764_v28, 0.0  ;;  %v1767_v4 = vadd.f32 %v5162_v63, %v4063_v60  ;;  %v1758_v12 = vpop.f32.mrb[71].mxu0  ;;  %v5222_v5 = vpop.f32.mrb[71].mxu1 }
 0x1bb   : > { %v2574_v55 = vmax.f32 %v1756_v42, 0.0  ;;  %v1759_v1 = vadd.f32 %v5162_v63, %v1758_v12  ;;  %v2708_v52 = vmax.f32 %v2292_v53, 0.0  ;;  %v3189_v8 = vadd.f32 %v3188_v9, %v3187_v47 }
 0x1bc   : > { %v2898_v40 = vadd.f32 %v2897_v10, %v2896_v34  ;;  %v2907_v22 = vadd.f32 %v2906_v15, %v2905_v11  ;;  %v2577_v30 = vmax.f32 %v1767_v4, 0.0  ;;  %v2912_v14 = vsel %vm2762_vm0, %v2576_v19, 0.0 }
 0x1bd   : > { %v2908_v46 = vsel %vm2762_vm0, %v2574_v55, 0.0  ;;  %v2575_v50 = vmax.f32 %v1759_v1, 0.0  ;;  %v2284_v34 = vadd.f32 %v5162_v63, %v5191_v41  ;;  %v2287_v4 = vadd.f32 %v5162_v63, %v5198_v38 }
 0x1be   : > { %v2899_v28 = vrot.slane %v2898_v40, 1  ;;  %v2909_v23 = vadd.f32 %v2908_v46, %v2907_v22  ;;  %v2914_v39 = vsel %vm2762_vm0, %v2577_v30, 0.0  ;;  %v3191_v41 = vadd.f32 %v3190_v7, %v3189_v8 }
 0x1bf   : > { %v2910_v42 = vsel %vm2762_vm0, %v2575_v50, 0.0  ;;  %v4066_v60 = vpop.f32.mrb[72].mxu0  ;;  %v5236_v10 = vpop.f32.mrb[72].mxu1  ;;  %v2706_v55 = vmax.f32 %v2284_v34, 0.0  ;;  %v2709_v1 = vmax.f32 %v2295_v2, 0.0 }
 0x1c0   : > { %v2900_v26 = vadd.f32 %v2899_v28, %v2898_v40  ;;  %v2911_v53 = vadd.f32 %v2910_v42, %v2909_v23  ;;  %v1780_v11 = vadd.f32 %v5162_v63, %v4066_v60  ;;  %v1771_v19 = vpop.f32.mrb[73].mxu0  ;;  %v5241_v12 = vpop.f32.mrb[73].mxu1  ;;  %v3196_v28 = vsel %vm2762_vm0, %v2708_v52, 0.0 }
 0x1c1   : > { %v1772_v9 = vadd.f32 %v5162_v63, %v1771_v19  ;;  %v4067_v15 = vpop.f32.mrb[74].mxu0  ;;  %v5244_v56 = vpop.f32.mrb[74].mxu1  ;;  %v3192_v23 = vsel %vm2762_vm0, %v2706_v55, 0.0  ;;  %v3198_v8 = vsel %vm2762_vm0, %v2709_v1, 0.0  ;;  %v2308_v52 = vadd.f32 %v5162_v63, %v5211_v54 }
 0x1c2   : > { %v3316_v35 = vpack.c.bf16 %v2900_v26, %v2900_v26  ;;  %v2913_v22 = vadd.f32 %v2912_v14, %v2911_v53  ;;  %v2580_v40 = vmax.f32 %v1780_v11, 0.0  ;;  %v1783_v30 = vadd.f32 %v5162_v63, %v4067_v15  ;;  %v1774_v46 = vpop.f32.mrb[75].mxu0  ;;  %v5247_v50 = vpop.f32.mrb[75].mxu1 }
 0x1c3   : > { %v2578_v47 = vmax.f32 %v1772_v9, 0.0  ;;  %v1775_v38 = vadd.f32 %v5162_v63, %v1774_v46  ;;  %v3193_v2 = vadd.f32 %v3192_v23, %v3191_v41  ;;  %v2707_v26 = vmax.f32 %v2287_v4, 0.0 }
 0x1c4   : > { %v3343_v42 = vunpack.c.l.b16 %v3316_v35  ;;  %v2920_v7 = vsel %vm2762_vm0, %v2580_v40, 0.0  ;;  %v2915_v60 = vadd.f32 %v2914_v39, %v2913_v22  ;;  %v2581_v19 = vmax.f32 %v1783_v30, 0.0 }
 0x1c5   : > { %v2916_v14 = vsel %vm2762_vm0, %v2578_v47, 0.0  ;;  %v2579_v34 = vmax.f32 %v1775_v38, 0.0  ;;  %v3194_v39 = vsel %vm2762_vm0, %v2707_v26, 0.0  ;;  %v2300_v55 = vadd.f32 %v5162_v63, %v5214_v37 }
 0x1c6   : > { %v5257_v53 = vsel %vm3350_vm1, %v3343_v42, %v5205_v32  ;;  %v2917_v11 = vadd.f32 %v2916_v14, %v2915_v60  ;;  %v2311_v4 = vadd.f32 %v5162_v63, %v5219_v45  ;;  %v3195_v22 = vadd.f32 %v3194_v39, %v3193_v2 }
 0x1c7   : > { %v2918_v9 = vsel %vm2762_vm0, %v2579_v34, 0.0  ;;  %v4070_v15 = vpop.f32.mrb[76].mxu0  ;;  %v5267_v41 = vpop.f32.mrb[76].mxu1  ;;  %v2712_v40 = vmax.f32 %v2308_v52, 0.0  ;;  %v2710_v47 = vmax.f32 %v2300_v55, 0.0  ;;  %v2303_v37 = vadd.f32 %v5162_v63, %v5222_v5 }
 0x1c8   : > { %v2919_v32 = vadd.f32 %v2918_v9, %v2917_v11  ;;  %v1796_v1 = vadd.f32 %v5162_v63, %v4070_v15  ;;  %v1787_v35 = vpop.f32.mrb[77].mxu0  ;;  %v5270_v54 = vpop.f32.mrb[77].mxu1  ;;  %v2713_v38 = vmax.f32 %v2311_v4, 0.0  ;;  %v3197_v34 = vadd.f32 %v3196_v28, %v3195_v22 }
 0x1c9   : > { %v1788_v30 = vadd.f32 %v5162_v63, %v1787_v35  ;;  %v4071_v46 = vpop.f32.mrb[78].mxu0  ;;  %v5275_v23 = vpop.f32.mrb[78].mxu1  ;;  %v2922_v26 = vsel %vm2762_vm0, %v2581_v19, 0.0  ;;  %v3200_v9 = vsel %vm2762_vm0, %v2710_v47, 0.0  ;;  %v3204_v39 = vsel %vm2762_vm0, %v2712_v40, 0.0 }
 0x1ca   : > { %v2921_v45 = vadd.f32 %v2920_v7, %v2919_v32  ;;  %v2584_v42 = vmax.f32 %v1796_v1, 0.0  ;;  %v1799_v60 = vadd.f32 %v5162_v63, %v4071_v46  ;;  %v1790_v14 = vpop.f32.mrb[79].mxu0  ;;  %v5278_v2 = vpop.f32.mrb[79].mxu1  ;;  %v3199_v7 = vadd.f32 %v3198_v8, %v3197_v34 }
 0x1cb   : > { %v2582_v11 = vmax.f32 %v1788_v30, 0.0  ;;  %v1791_v52 = vadd.f32 %v5162_v63, %v1790_v14  ;;  %v2711_v28 = vmax.f32 %v2303_v37, 0.0  ;;  %v3206_v19 = vsel %vm2762_vm0, %v2713_v38, 0.0 }
 0x1cc   : > { %v2928_v15 = vsel %vm2762_vm0, %v2584_v42, 0.0  ;;  %v2923_v5 = vadd.f32 %v2922_v26, %v2921_v45  ;;  %v2585_v4 = vmax.f32 %v1799_v60, 0.0  ;;  %v3201_v35 = vadd.f32 %v3200_v9, %v3199_v7 }
 0x1cd   : > { %v2924_v55 = vsel %vm2762_vm0, %v2582_v11, 0.0  ;;  %v2583_v32 = vmax.f32 %v1791_v52, 0.0  ;;  %v2324_v22 = vadd.f32 %v5162_v63, %v5236_v10  ;;  %v3202_v47 = vsel %vm2762_vm0, %v2711_v28, 0.0 }
 0x1ce   : > { %v2925_v1 = vadd.f32 %v2924_v55, %v2923_v5  ;;  %v2316_v8 = vadd.f32 %v5162_v63, %v5241_v12  ;;  %v2327_v40 = vadd.f32 %v5162_v63, %v5244_v56  ;;  %v3203_v60 = vadd.f32 %v3202_v47, %v3201_v35 }
 0x1cf   : > { %v2926_v30 = vsel %vm2762_vm0, %v2583_v32, 0.0  ;;  %v4074_v46 = vpop.f32.mrb[80].mxu0  ;;  %v5295_v45 = vpop.f32.mrb[80].mxu1  ;;  %v2716_v14 = vmax.f32 %v2324_v22, 0.0  ;;  %v2319_v12 = vadd.f32 %v5162_v63, %v5247_v50 }
 0x1d0   : > { %v2927_v37 = vadd.f32 %v2926_v30, %v2925_v1  ;;  %v1812_v42 = vadd.f32 %v5162_v63, %v4074_v46  ;;  %v1803_v38 = vpop.f32.mrb[81].mxu0  ;;  %v5298_v10 = vpop.f32.mrb[81].mxu1  ;;  %v2714_v11 = vmax.f32 %v2316_v8, 0.0  ;;  %v2717_v52 = vmax.f32 %v2327_v40, 0.0 }
 0x1d1   : > { %v1804_v34 = vadd.f32 %v5162_v63, %v1803_v38  ;;  %v4075_v26 = vpop.f32.mrb[82].mxu0  ;;  %v5303_v9 = vpop.f32.mrb[82].mxu1  ;;  %v3205_v32 = vadd.f32 %v3204_v39, %v3203_v60  ;;  %v2930_v1 = vsel %vm2762_vm0, %v2585_v4, 0.0  ;;  %v3212_v47 = vsel %vm2762_vm0, %v2716_v14, 0.0 }
 0x1d2   : > { %v2929_v56 = vadd.f32 %v2928_v15, %v2927_v37  ;;  %v2588_v5 = vmax.f32 %v1812_v42, 0.0  ;;  %v1815_v7 = vadd.f32 %v5162_v63, %v4075_v26  ;;  %v1806_v55 = vpop.f32.mrb[83].mxu0  ;;  %v5306_v28 = vpop.f32.mrb[83].mxu1  ;;  %v3208_v30 = vsel %vm2762_vm0, %v2714_v11, 0.0 }
 0x1d3   : > { %v2586_v35 = vmax.f32 %v1804_v34, 0.0  ;;  %v1807_v22 = vadd.f32 %v5162_v63, %v1806_v55  ;;  %v3207_v15 = vadd.f32 %v3206_v19, %v3205_v32  ;;  %v2715_v39 = vmax.f32 %v2319_v12, 0.0 }
 0x1d4   : > { %v2936_v46 = vsel %vm2762_vm0, %v2588_v5, 0.0  ;;  %v2931_v50 = vadd.f32 %v2930_v1, %v2929_v56  ;;  %v2589_v40 = vmax.f32 %v1815_v7, 0.0  ;;  %v3214_v4 = vsel %vm2762_vm0, %v2717_v52, 0.0 }
 0x1d5   : > { %v2932_v8 = vsel %vm2762_vm0, %v2586_v35, 0.0  ;;  %v2587_v37 = vmax.f32 %v1807_v22, 0.0  ;;  %v3209_v38 = vadd.f32 %v3208_v30, %v3207_v15  ;;  %v2340_v60 = vadd.f32 %v5162_v63, %v5267_v41 }
 0x1d6   : > { %v2933_v42 = vadd.f32 %v2932_v8, %v2931_v50  ;;  %v3210_v11 = vsel %vm2762_vm0, %v2715_v39, 0.0  ;;  %v2332_v19 = vadd.f32 %v5162_v63, %v5270_v54  ;;  %v2343_v14 = vadd.f32 %v5162_v63, %v5275_v23 }
 0x1d7   : > { %v2934_v34 = vsel %vm2762_vm0, %v2587_v37, 0.0  ;;  %v4078_v26 = vpop.f32.mrb[84].mxu0  ;;  %v5323_v56 = vpop.f32.mrb[84].mxu1  ;;  %v3211_v7 = vadd.f32 %v3210_v11, %v3209_v38  ;;  %v2720_v55 = vmax.f32 %v2340_v60, 0.0  ;;  %v2335_v54 = vadd.f32 %v5162_v63, %v5278_v2 }
 0x1d8   : > { %v2935_v12 = vadd.f32 %v2934_v34, %v2933_v42  ;;  %v1828_v5 = vadd.f32 %v5162_v63, %v4078_v26  ;;  %v1819_v52 = vpop.f32.mrb[85].mxu0  ;;  %v5326_v41 = vpop.f32.mrb[85].mxu1  ;;  %v2718_v35 = vmax.f32 %v2332_v19, 0.0  ;;  %v2721_v22 = vmax.f32 %v2343_v14, 0.0 }
 0x1d9   : > { %v1820_v32 = vadd.f32 %v5162_v63, %v1819_v52  ;;  %v4079_v1 = vpop.f32.mrb[86].mxu0  ;;  %v5331_v30 = vpop.f32.mrb[86].mxu1  ;;  %v3213_v37 = vadd.f32 %v3212_v47, %v3211_v7  ;;  %v2938_v42 = vsel %vm2762_vm0, %v2589_v40, 0.0  ;;  %v3220_v11 = vsel %vm2762_vm0, %v2720_v55, 0.0 }
 0x1da   : > { %v2937_v23 = vadd.f32 %v2936_v46, %v2935_v12  ;;  %v2592_v50 = vmax.f32 %v1828_v5, 0.0  ;;  %v1831_v15 = vadd.f32 %v5162_v63, %v4079_v1  ;;  %v1822_v8 = vpop.f32.mrb[87].mxu0  ;;  %v5334_v39 = vpop.f32.mrb[87].mxu1  ;;  %v3216_v34 = vsel %vm2762_vm0, %v2718_v35, 0.0 }
 0x1db   : > { %v2590_v38 = vmax.f32 %v1820_v32, 0.0  ;;  %v1823_v60 = vadd.f32 %v5162_v63, %v1822_v8  ;;  %v3215_v46 = vadd.f32 %v3214_v4, %v3213_v37  ;;  %v2719_v47 = vmax.f32 %v2335_v54, 0.0 }
 0x1dc   : > { %v2944_v26 = vsel %vm2762_vm0, %v2592_v50, 0.0  ;;  %v2939_v2 = vadd.f32 %v2938_v42, %v2937_v23  ;;  %v2593_v14 = vmax.f32 %v1831_v15, 0.0  ;;  %v3222_v40 = vsel %vm2762_vm0, %v2721_v22, 0.0 }
 0x1dd   : > { %v2940_v19 = vsel %vm2762_vm0, %v2590_v38, 0.0  ;;  %v2591_v12 = vmax.f32 %v1823_v60, 0.0  ;;  %v3217_v52 = vadd.f32 %v3216_v34, %v3215_v46  ;;  %v2356_v7 = vadd.f32 %v5162_v63, %v5295_v45 }
 0x1de   : > { %v2941_v5 = vadd.f32 %v2940_v19, %v2939_v2  ;;  %v3218_v35 = vsel %vm2762_vm0, %v2719_v47, 0.0  ;;  %v2348_v4 = vadd.f32 %v5162_v63, %v5298_v10  ;;  %v2359_v55 = vadd.f32 %v5162_v63, %v5303_v9 }
 0x1df   : > { %v2942_v32 = vsel %vm2762_vm0, %v2591_v12, 0.0  ;;  %v4082_v1 = vpop.f32.mrb[88].mxu0  ;;  %v5351_v23 = vpop.f32.mrb[88].mxu1  ;;  %v3219_v15 = vadd.f32 %v3218_v35, %v3217_v52  ;;  %v2724_v8 = vmax.f32 %v2356_v7, 0.0  ;;  %v2946_v37 = vsel %vm2762_vm0, %v2593_v14, 0.0 }
 0x1e0   : > { %v2943_v54 = vadd.f32 %v2942_v32, %v2941_v5  ;;  %v1844_v50 = vadd.f32 %v5162_v63, %v4082_v1  ;;  %v1835_v22 = vpop.f32.mrb[89].mxu0  ;;  %v5354_v45 = vpop.f32.mrb[89].mxu1  ;;  %v2722_v60 = vmax.f32 %v2348_v4, 0.0  ;;  %v2351_v10 = vadd.f32 %v5162_v63, %v5306_v28 }
 0x1e1   : > { %v1836_v42 = vadd.f32 %v5162_v63, %v1835_v22  ;;  %v4083_v38 = vpop.f32.mrb[90].mxu0  ;;  %v5360_v9 = vpop.f32.mrb[90].mxu1  ;;  %v3221_v12 = vadd.f32 %v3220_v11, %v3219_v15  ;;  %v2725_v7 = vmax.f32 %v2359_v55, 0.0  ;;  %v3228_v1 = vsel %vm2762_vm0, %v2724_v8, 0.0 }
 0x1e2   : > { %v2945_v34 = vadd.f32 %v2944_v26, %v2943_v54  ;;  %v2596_v2 = vmax.f32 %v1844_v50, 0.0  ;;  %v1847_v46 = vadd.f32 %v5162_v63, %v4083_v38  ;;  %v1838_v19 = vpop.f32.mrb[91].mxu0  ;;  %v5363_v47 = vpop.f32.mrb[91].mxu1  ;;  %v3224_v52 = vsel %vm2762_vm0, %v2722_v60, 0.0 }
 0x1e3   : > { %v2594_v5 = vmax.f32 %v1836_v42, 0.0  ;;  %v1839_v14 = vadd.f32 %v5162_v63, %v1838_v19  ;;  %v3223_v28 = vadd.f32 %v3222_v40, %v3221_v12  ;;  %v2723_v54 = vmax.f32 %v2351_v10, 0.0 }
 0x1e4   : > { %v2947_v32 = vadd.f32 %v2946_v37, %v2945_v34  ;;  %v2952_v35 = vsel %vm2762_vm0, %v2596_v2, 0.0  ;;  %v2597_v11 = vmax.f32 %v1847_v46, 0.0  ;;  %v2372_v15 = vadd.f32 %v5162_v63, %v5323_v56 }
 0x1e5   : > { %v2948_v26 = vsel %vm2762_vm0, %v2594_v5, 0.0  ;;  %v2595_v4 = vmax.f32 %v1839_v14, 0.0  ;;  %v3225_v22 = vadd.f32 %v3224_v52, %v3223_v28  ;;  %v3230_v55 = vsel %vm2762_vm0, %v2725_v7, 0.0 }
 0x1e6   : > { %v2949_v50 = vadd.f32 %v2948_v26, %v2947_v32  ;;  %v3226_v8 = vsel %vm2762_vm0, %v2723_v54, 0.0  ;;  %v2364_v40 = vadd.f32 %v5162_v63, %v5326_v41  ;;  %v2375_v56 = vadd.f32 %v5162_v63, %v5331_v30 }
 0x1e7   : > { %v2950_v42 = vsel %vm2762_vm0, %v2595_v4, 0.0  ;;  %v4086_v38 = vpop.f32.mrb[92].mxu0  ;;  %v5377_v37 = vpop.f32.mrb[92].mxu1  ;;  %v3227_v2 = vadd.f32 %v3226_v8, %v3225_v22  ;;  %v2728_v5 = vmax.f32 %v2372_v15, 0.0  ;;  %v2367_v41 = vadd.f32 %v5162_v63, %v5334_v39 }
 0x1e8   : > { %v2951_v60 = vadd.f32 %v2950_v42, %v2949_v50  ;;  %v1860_v10 = vadd.f32 %v5162_v63, %v4086_v38  ;;  %v1851_v34 = vpop.f32.mrb[93].mxu0  ;;  %v5382_v46 = vpop.f32.mrb[93].mxu1  ;;  %v2726_v14 = vmax.f32 %v2364_v40, 0.0  ;;  %v2954_v7 = vsel %vm2762_vm0, %v2597_v11, 0.0 }
 0x1e9   : > { %v1852_v19 = vadd.f32 %v5162_v63, %v1851_v34  ;;  %v4087_v12 = vpop.f32.mrb[94].mxu0  ;;  %v5387_v52 = vpop.f32.mrb[94].mxu1  ;;  %v3229_v4 = vadd.f32 %v3228_v1, %v3227_v2  ;;  %v2729_v39 = vmax.f32 %v2375_v56, 0.0  ;;  %v2727_v11 = vmax.f32 %v2367_v41, 0.0 }
 0x1ea   : > { %v2953_v32 = vadd.f32 %v2952_v35, %v2951_v60  ;;  %v2600_v28 = vmax.f32 %v1860_v10, 0.0  ;;  %v1854_v26 = vpop.f32.mrb[95].mxu0  ;;  %v5390_v54 = vpop.f32.mrb[95].mxu1  ;;  %v1863_v50 = vadd.f32 %v5162_v63, %v4087_v12  ;;  %v3232_v15 = vsel %vm2762_vm0, %v2726_v14, 0.0 }
 0x1eb   : > { %v2598_v30 = vmax.f32 %v1852_v19, 0.0  ;;  %v1855_v22 = vadd.f32 %v5162_v63, %v1854_v26  ;;  %v3231_v38 = vadd.f32 %v3230_v55, %v3229_v4  ;;  %v3236_v35 = vsel %vm2762_vm0, %v2728_v5, 0.0 }
 0x1ec   : > { %v2955_v42 = vadd.f32 %v2954_v7, %v2953_v32  ;;  %v2960_v1 = vsel %vm2762_vm0, %v2600_v28, 0.0  ;;  %v2388_v34 = vadd.f32 %v5162_v63, %v5351_v23  ;;  %v2601_v2 = vmax.f32 %v1863_v50, 0.0 }
 0x1ed   : > { %v2956_v8 = vsel %vm2762_vm0, %v2598_v30, 0.0  ;;  %v2599_v40 = vmax.f32 %v1855_v22, 0.0  ;;  %v3233_v10 = vadd.f32 %v3232_v15, %v3231_v38  ;;  %v3234_v55 = vsel %vm2762_vm0, %v2727_v11, 0.0 }
 0x1ee   : > { %v2957_v60 = vadd.f32 %v2956_v8, %v2955_v42  ;;  %v2380_v56 = vadd.f32 %v5162_v63, %v5354_v45  ;;  %v2391_v28 = vadd.f32 %v5162_v63, %v5360_v9  ;;  %v3238_v30 = vsel %vm2762_vm0, %v2729_v39, 0.0 }
 0x1ef   : > { %v2958_v19 = vsel %vm2762_vm0, %v2599_v40, 0.0  ;;  %v4090_v12 = vpop.f32.mrb[96].mxu0  ;;  %v5404_v14 = vpop.f32.mrb[96].mxu1  ;;  %v3235_v32 = vadd.f32 %v3234_v55, %v3233_v10  ;;  %v2732_v50 = vmax.f32 %v2388_v34, 0.0  ;;  %v2383_v45 = vadd.f32 %v5162_v63, %v5363_v47 }
 0x1f0   : > { %v2959_v5 = vadd.f32 %v2958_v19, %v2957_v60  ;;  %v1876_v41 = vadd.f32 %v5162_v63, %v4090_v12  ;;  %v1867_v7 = vpop.f32.mrb[97].mxu0  ;;  %v5409_v23 = vpop.f32.mrb[97].mxu1  ;;  %v2730_v40 = vmax.f32 %v2380_v56, 0.0  ;;  %v2962_v11 = vsel %vm2762_vm0, %v2601_v2, 0.0 }
 0x1f1   : > { %v1868_v26 = vadd.f32 %v5162_v63, %v1867_v7  ;;  %v4091_v4 = vpop.f32.mrb[98].mxu0  ;;  %v5415_v22 = vpop.f32.mrb[98].mxu1  ;;  %v3237_v8 = vadd.f32 %v3236_v35, %v3235_v32  ;;  %v2733_v47 = vmax.f32 %v2391_v28, 0.0  ;;  %v3249_v7 = vsel %vm2762_vm0, %v2732_v50, 0.0 }
 0x1f2   : > { %v2961_v15 = vadd.f32 %v2960_v1, %v2959_v5  ;;  %v1879_v42 = vadd.f32 %v5162_v63, %v4091_v4  ;;  %v1870_v38 = vpop.f32.mrb[99].mxu0  ;;  %v5418_v9 = vpop.f32.mrb[99].mxu1  ;;  %v2604_v34 = vmax.f32 %v1876_v41, 0.0  ;;  %v2731_v1 = vmax.f32 %v2383_v45, 0.0 }
 0x1f3   : > { %v2602_v60 = vmax.f32 %v1868_v26, 0.0  ;;  %v1871_v10 = vadd.f32 %v5162_v63, %v1870_v38  ;;  %v5422_v19 = vadd.f32 %v3238_v30, %v3237_v8  ;;  %v3246_v35 = vsel %vm2762_vm0, %v2730_v40, 0.0 }
 0x1f4   : > { %v2963_v39 = vadd.f32 %v2962_v11, %v2961_v15  ;;  %v2605_v12 = vmax.f32 %v1879_v42, 0.0  ;;  %v3247_v26 = vsel %vm2762_vm0, %v2731_v1, 0.0  ;;  %v2396_v41 = vadd.f32 %v5162_v63, %v5382_v46 }
 0x1f5   : > { %5824 = vst [vmem:[#allocation10_spill] sm:$0xff] %v5422_v19  ;;  %v2603_v55 = vmax.f32 %v1871_v10, 0.0  ;;  %v2970_v56 = vsel %vm2762_vm0, %v2602_v60, 0.0  ;;  %v2973_v30 = vsel %vm2762_vm0, %v2604_v34, 0.0  ;;  %v3251_v50 = vsel %vm2762_vm0, %v2733_v47, 0.0 }
 0x1f6   : > { %v2964_v5 = vrot.slane %v2963_v39, 4  ;;  %v2975_v38 = vsel %vm2762_vm0, %v2605_v12, 0.0  ;;  %v3248_v60 = vadd.f32 %v3247_v26, %v3246_v35  ;;  %v2404_v34 = vadd.f32 %v5162_v63, %v5377_v37 }
 0x1f7   : > { %v2971_v2 = vsel %vm2762_vm0, %v2603_v55, 0.0  ;;  %v4094_v32 = vpop.f32.mrb[100].mxu0  ;;  %v5431_v4 = vpop.f32.mrb[100].mxu1  ;;  %v2734_v1 = vmax.f32 %v2396_v41, 0.0 }
 0x1f8   : > { %v2965_v28 = vadd.f32 %v2964_v5, %v2963_v39  ;;  %v2972_v45 = vadd.f32 %v2971_v2, %v2970_v56  ;;  %v1883_v15 = vpop.f32.mrb[101].mxu0  ;;  %v5435_v42 = vpop.f32.mrb[101].mxu1  ;;  %v1892_v8 = vadd.f32 %v5162_v63, %v4094_v32  ;;  %v3250_v2 = vadd.f32 %v3249_v7, %v3248_v60 }
 0x1f9   : > { %v1884_v40 = vadd.f32 %v5162_v63, %v1883_v15  ;;  %v4095_v11 = vpop.f32.mrb[102].mxu0  ;;  %v5440_v46 = vpop.f32.mrb[102].mxu1  ;;  %v2736_v33 = vmax.f32 %v2404_v34, 0.0 }
 0x1fa   : > { %v2966_v10 = vrot.slane %v2965_v28, 2  ;;  %v2974_v39 = vadd.f32 %v2973_v30, %v2972_v45  ;;  %v1886_v55 = vpop.f32.mrb[103].mxu0  ;;  %v5444_v47 = vpop.f32.mrb[103].mxu1  ;;  %v1895_v12 = vadd.f32 %v5162_v63, %v4095_v11  ;;  %v2608_v35 = vmax.f32 %v1892_v8, 0.0 }
 0x1fb   : > { %v2606_v5 = vmax.f32 %v1884_v40, 0.0  ;;  %v1887_v56 = vadd.f32 %v5162_v63, %v1886_v55  ;;  %v3252_v19 = vadd.f32 %v3251_v50, %v3250_v2  ;;  %v3253_v40 = vsel %vm2762_vm0, %v2734_v1, 0.0 }
 0x1fc   : > { %v2967_v32 = vadd.f32 %v2966_v10, %v2965_v28  ;;  %v2976_v15 = vadd.f32 %v2975_v38, %v2974_v39  ;;  %v2609_v37 = vmax.f32 %v1895_v12, 0.0  ;;  %v2407_v11 = vadd.f32 %v5162_v63, %v5387_v52 }
 0x1fd   : > { %v2977_v26 = vsel %vm2762_vm0, %v2606_v5, 0.0  ;;  %v2607_v51 = vmax.f32 %v1887_v56, 0.0  ;;  %v3254_v10 = vadd.f32 %v3253_v40, %v3252_v19  ;;  %v2981_v50 = vsel %vm2762_vm0, %v2608_v35, 0.0 }
 0x1fe   : > { %v2968_v30 = vrot.slane %v2967_v32, 1  ;;  %v2978_v45 = vadd.f32 %v2977_v26, %v2976_v15  ;;  %v2737_v34 = vmax.f32 %v2407_v11, 0.0  ;;  %v2399_v1 = vadd.f32 %v5162_v63, %v5390_v54 }
 0x1ff   : > { %v2979_v41 = vsel %vm2762_vm0, %v2607_v51, 0.0  ;;  %v4098_v20 = vpop.f32.mrb[104].mxu0  ;;  %v5453_v7 = vpop.f32.mrb[104].mxu1  ;;  %v3257_v54 = vsel %vm2762_vm0, %v2736_v33, 0.0 }
 0x200   : > { %v2969_v28 = vadd.f32 %v2968_v30, %v2967_v32  ;;  %v2980_v38 = vadd.f32 %v2979_v41, %v2978_v45  ;;  %v1908_v8 = vadd.f32 %v5162_v63, %v4098_v20  ;;  %v1899_v60 = vpop.f32.mrb[105].mxu0  ;;  %v5456_v39 = vpop.f32.mrb[105].mxu1  ;;  %v2983_v32 = vsel %vm2762_vm0, %v2609_v37, 0.0 }
 0x201   : > { %v1900_v51 = vadd.f32 %v5162_v63, %v1899_v60  ;;  %v4099_v55 = vpop.f32.mrb[106].mxu0  ;;  %v5462_v52 = vpop.f32.mrb[106].mxu1  ;;  %v3259_v45 = vsel %vm2762_vm0, %v2737_v34, 0.0  ;;  %v2420_v60 = vadd.f32 %v5162_v63, %v5404_v14  ;;  %v2423_v34 = vadd.f32 %v5162_v63, %v5415_v22 }
 0x202   : > { %v3317_v5 = vpack.c.bf16 %v2969_v28, %v2969_v28  ;;  %v2982_v12 = vadd.f32 %v2981_v50, %v2980_v38  ;;  %v2612_v56 = vmax.f32 %v1908_v8, 0.0  ;;  %v1911_v20 = vadd.f32 %v5162_v63, %v4099_v55  ;;  %v1902_v2 = vpop.f32.mrb[107].mxu0  ;;  %v5465_v19 = vpop.f32.mrb[107].mxu1 }
 0x203   : > { %v2610_v15 = vmax.f32 %v1900_v51, 0.0  ;;  %v1903_v35 = vadd.f32 %v5162_v63, %v1902_v2  ;;  %v2735_v28 = vmax.f32 %v2399_v1, 0.0  ;;  %v2412_v55 = vadd.f32 %v5162_v63, %v5409_v23 }
 0x204   : > { %v3344_v26 = vunpack.c.l.b16 %v3317_v5  ;;  %v2984_v30 = vadd.f32 %v2983_v32, %v2982_v12  ;;  %v2989_v41 = vsel %vm2762_vm0, %v2612_v56, 0.0  ;;  %v2613_v37 = vmax.f32 %v1911_v20, 0.0 }
 0x205   : > { %v2985_v40 = vsel %vm2762_vm0, %v2610_v15, 0.0  ;;  %v2611_v11 = vmax.f32 %v1903_v35, 0.0  ;;  %v3255_v33 = vsel %vm2762_vm0, %v2735_v28, 0.0  ;;  %v2740_v20 = vmax.f32 %v2420_v60, 0.0 }
 0x206   : > { %v5474_v38 = vsel %vm3352_vm2, %v3344_v26, %v5257_v53  ;;  %v2986_v8 = vadd.f32 %v2985_v40, %v2984_v30  ;;  %v3256_v56 = vadd.f32 %v3255_v33, %v3254_v10  ;;  %v2738_v15 = vmax.f32 %v2412_v55, 0.0 }
 0x207   : > { %v2987_v50 = vsel %vm2762_vm0, %v2611_v11, 0.0  ;;  %v4102_v51 = vpop.f32.mrb[108].mxu0  ;;  %v5484_v1 = vpop.f32.mrb[108].mxu1  ;;  %v2741_v35 = vmax.f32 %v2423_v34, 0.0  ;;  %v2415_v23 = vadd.f32 %v5162_v63, %v5418_v9  ;;  %v3265_v55 = vsel %vm2762_vm0, %v2740_v20, 0.0 }
 0x208   : > { %v2988_v53 = vadd.f32 %v2987_v50, %v2986_v8  ;;  %v1924_v5 = vadd.f32 %v5162_v63, %v4102_v51  ;;  %v1915_v12 = vpop.f32.mrb[109].mxu0  ;;  %v5487_v14 = vpop.f32.mrb[109].mxu1  ;;  %v3258_v28 = vadd.f32 %v3257_v54, %v3256_v56  ;;  %v2991_v8 = vsel %vm2762_vm0, %v2613_v37, 0.0 }
 0x209   : > { %v1916_v2 = vadd.f32 %v5162_v63, %v1915_v12  ;;  %v4103_v32 = vpop.f32.mrb[110].mxu0  ;;  %v5492_v26 = vpop.f32.mrb[110].mxu1  ;;  %v3261_v51 = vsel %vm2762_vm0, %v2738_v15, 0.0  ;;  %v2739_v54 = vmax.f32 %v2415_v23, 0.0  ;;  %v3267_v37 = vsel %vm2762_vm0, %v2741_v35, 0.0 }
 0x20a   : > { %v2990_v22 = vadd.f32 %v2989_v41, %v2988_v53  ;;  %v2616_v30 = vmax.f32 %v1924_v5, 0.0  ;;  %v1927_v40 = vadd.f32 %v5162_v63, %v4103_v32  ;;  %v1918_v11 = vpop.f32.mrb[111].mxu0  ;;  %v5495_v10 = vpop.f32.mrb[111].mxu1  ;;  %v3260_v41 = vadd.f32 %v3259_v45, %v3258_v28  ;;  %v5511_v45 = vld [vmem:[%s5804_s2] ss:$0 sm:$0xff] }
 0x20b   : > { %v2614_v60 = vmax.f32 %v1916_v2, 0.0  ;;  %v1919_v50 = vadd.f32 %v5162_v63, %v1918_v11  ;;  %v2436_v2 = vadd.f32 %v5162_v63, %v5431_v4  ;;  %v2428_v20 = vadd.f32 %v5511_v45, %v5435_v42 }
 0x20c   : > { %v2997_v33 = vsel %vm2762_vm0, %v2616_v30, 0.0  ;;  %v2992_v9 = vadd.f32 %v2991_v8, %v2990_v22  ;;  %v2617_v53 = vmax.f32 %v1927_v40, 0.0  ;;  %v3262_v56 = vadd.f32 %v3261_v51, %v3260_v41 }
 0x20d   : > { %v2993_v34 = vsel %vm2762_vm0, %v2614_v60, 0.0  ;;  %v2615_v5 = vmax.f32 %v1919_v50, 0.0  ;;  %v3263_v22 = vsel %vm2762_vm0, %v2739_v54, 0.0  ;;  %v2439_v23 = vadd.f32 %v5511_v45, %v5440_v46 }
 0x20e   : > { %v2994_v12 = vadd.f32 %v2993_v34, %v2992_v9  ;;  %v3264_v40 = vadd.f32 %v3263_v22, %v3262_v56  ;;  %v2744_v11 = vmax.f32 %v2436_v2, 0.0  ;;  %v2742_v50 = vmax.f32 %v2428_v20, 0.0 }
 0x20f   : > { %v2995_v32 = vsel %vm2762_vm0, %v2615_v5, 0.0  ;;  %v4106_v15 = vpop.f32.mrb[112].mxu0  ;;  %v5517_v35 = vpop.f32.mrb[112].mxu1  ;;  %v2745_v51 = vmax.f32 %v2439_v23, 0.0  ;;  %v2431_v42 = vadd.f32 %v5511_v45, %v5444_v47  ;;  %v2999_v56 = vsel %vm2762_vm0, %v2617_v53, 0.0 }
 0x210   : > { %v2996_v30 = vadd.f32 %v2995_v32, %v2994_v12  ;;  %v1940_v63 = vadd.f32 %v5511_v45, %v4106_v15  ;;  %v1931_v4 = vpop.f32.mrb[113].mxu0  ;;  %v5520_v28 = vpop.f32.mrb[113].mxu1  ;;  %v3266_v54 = vadd.f32 %v3265_v55, %v3264_v40  ;;  %v3269_v15 = vsel %vm2762_vm0, %v2742_v50, 0.0 }
 0x211   : > { %v1932_v8 = vadd.f32 %v5511_v45, %v1931_v4  ;;  %v4107_v60 = vpop.f32.mrb[114].mxu0  ;;  %v5525_v9 = vpop.f32.mrb[114].mxu1  ;;  %v3273_v20 = vsel %vm2762_vm0, %v2744_v11, 0.0  ;;  %v2743_v55 = vmax.f32 %v2431_v42, 0.0  ;;  %v3275_v53 = vsel %vm2762_vm0, %v2745_v51, 0.0 }
 0x212   : > { %v2998_v46 = vadd.f32 %v2997_v33, %v2996_v30  ;;  %v2620_v41 = vmax.f32 %v1940_v63, 0.0  ;;  %v1943_v34 = vadd.f32 %v5511_v45, %v4107_v60  ;;  %v1934_v5 = vpop.f32.mrb[115].mxu0  ;;  %v5528_v12 = vpop.f32.mrb[115].mxu1  ;;  %v3268_v33 = vadd.f32 %v3267_v37, %v3266_v54 }
 0x213   : > { %v2618_v2 = vmax.f32 %v1932_v8, 0.0  ;;  %v1935_v32 = vadd.f32 %v5511_v45, %v1934_v5  ;;  %v2452_v8 = vadd.f32 %v5511_v45, %v5453_v7  ;;  %v2444_v37 = vadd.f32 %v5511_v45, %v5456_v39 }
 0x214   : > { %v3005_v22 = vsel %vm2762_vm0, %v2620_v41, 0.0  ;;  %v3000_v47 = vadd.f32 %v2999_v56, %v2998_v46  ;;  %v2621_v30 = vmax.f32 %v1943_v34, 0.0  ;;  %v3270_v40 = vadd.f32 %v3269_v15, %v3268_v33 }
 0x215   : > { %v3001_v23 = vsel %vm2762_vm0, %v2618_v2, 0.0  ;;  %v2619_v63 = vmax.f32 %v1935_v32, 0.0  ;;  %v3271_v46 = vsel %vm2762_vm0, %v2743_v55, 0.0  ;;  %v2455_v11 = vadd.f32 %v5511_v45, %v5462_v52 }
 0x216   : > { %v3002_v4 = vadd.f32 %v3001_v23, %v3000_v47  ;;  %v3272_v5 = vadd.f32 %v3271_v46, %v3270_v40  ;;  %v2748_v54 = vmax.f32 %v2452_v8, 0.0  ;;  %v2746_v32 = vmax.f32 %v2444_v37, 0.0 }
 0x217   : > { %v3003_v60 = vsel %vm2762_vm0, %v2619_v63, 0.0  ;;  %v4110_v50 = vpop.f32.mrb[116].mxu0  ;;  %v5545_v41 = vpop.f32.mrb[116].mxu1  ;;  %v2749_v15 = vmax.f32 %v2455_v11, 0.0  ;;  %v2447_v39 = vadd.f32 %v5511_v45, %v5465_v19  ;;  %v3007_v40 = vsel %vm2762_vm0, %v2621_v30, 0.0 }
 0x218   : > { %v3004_v42 = vadd.f32 %v3003_v60, %v3002_v4  ;;  %v1956_v34 = vadd.f32 %v5511_v45, %v4110_v50  ;;  %v1947_v51 = vpop.f32.mrb[117].mxu0  ;;  %v5548_v7 = vpop.f32.mrb[117].mxu1  ;;  %v3274_v55 = vadd.f32 %v3273_v20, %v3272_v5  ;;  %v3277_v50 = vsel %vm2762_vm0, %v2746_v32, 0.0 }
 0x219   : > { %v1948_v56 = vadd.f32 %v5511_v45, %v1947_v51  ;;  %v4111_v2 = vpop.f32.mrb[118].mxu0  ;;  %v5553_v47 = vpop.f32.mrb[118].mxu1  ;;  %v3281_v37 = vsel %vm2762_vm0, %v2748_v54, 0.0  ;;  %v2747_v20 = vmax.f32 %v2447_v39, 0.0  ;;  %v3283_v30 = vsel %vm2762_vm0, %v2749_v15, 0.0 }
 0x21a   : > { %v3006_v52 = vadd.f32 %v3005_v22, %v3004_v42  ;;  %v2624_v33 = vmax.f32 %v1956_v34, 0.0  ;;  %v1959_v23 = vadd.f32 %v5511_v45, %v4111_v2  ;;  %v1950_v63 = vpop.f32.mrb[119].mxu0  ;;  %v5556_v4 = vpop.f32.mrb[119].mxu1  ;;  %v3276_v22 = vadd.f32 %v3275_v53, %v3274_v55 }
 0x21b   : > { %v2622_v8 = vmax.f32 %v1948_v56, 0.0  ;;  %v1951_v60 = vadd.f32 %v5511_v45, %v1950_v63  ;;  %v2468_v56 = vadd.f32 %v5511_v45, %v5484_v1  ;;  %v2460_v53 = vadd.f32 %v5511_v45, %v5487_v14 }
 0x21c   : > { %v3013_v46 = vsel %vm2762_vm0, %v2624_v33, 0.0  ;;  %v3008_v19 = vadd.f32 %v3007_v40, %v3006_v52  ;;  %v2625_v42 = vmax.f32 %v1959_v23, 0.0  ;;  %v3278_v5 = vadd.f32 %v3277_v50, %v3276_v22 }
 0x21d   : > { %v3009_v11 = vsel %vm2762_vm0, %v2622_v8, 0.0  ;;  %v2623_v34 = vmax.f32 %v1951_v60, 0.0  ;;  %v3279_v52 = vsel %vm2762_vm0, %v2747_v20, 0.0  ;;  %v2471_v54 = vadd.f32 %v5511_v45, %v5492_v26 }
 0x21e   : > { %v3010_v51 = vadd.f32 %v3009_v11, %v3008_v19  ;;  %v3280_v63 = vadd.f32 %v3279_v52, %v3278_v5  ;;  %v2752_v15 = vmax.f32 %v2468_v56, 0.0  ;;  %v2750_v40 = vmax.f32 %v2460_v53, 0.0 }
 0x21f   : > { %v3011_v2 = vsel %vm2762_vm0, %v2623_v34, 0.0  ;;  %v4114_v32 = vpop.f32.mrb[120].mxu0  ;;  %v2753_v8 = vmax.f32 %v2471_v54, 0.0  ;;  %v2463_v60 = vadd.f32 %v5511_v45, %v5495_v10  ;;  %v3015_v11 = vsel %vm2762_vm0, %v2625_v42, 0.0 }
 0x220   : > { %v3012_v33 = vadd.f32 %v3011_v2, %v3010_v51  ;;  %v1972_v39 = vadd.f32 %v5511_v45, %v4114_v32  ;;  %v1963_v23 = vpop.f32.mrb[121].mxu0  ;;  %v3282_v26 = vadd.f32 %v3281_v37, %v3280_v63  ;;  %v3285_v51 = vsel %vm2762_vm0, %v2750_v40, 0.0 }
 0x221   : > { %v1964_v55 = vadd.f32 %v5511_v45, %v1963_v23  ;;  %v4115_v1 = vpop.f32.mrb[122].mxu0  ;;  %v3289_v2 = vsel %vm2762_vm0, %v2752_v15, 0.0  ;;  %v2751_v53 = vmax.f32 %v2463_v60, 0.0  ;;  %v3291_v42 = vsel %vm2762_vm0, %v2753_v8, 0.0 }
 0x222   : > { %v3014_v50 = vadd.f32 %v3013_v46, %v3012_v33  ;;  %v2628_v19 = vmax.f32 %v1972_v39, 0.0  ;;  %v1975_v14 = vadd.f32 %v5511_v45, %v4115_v1  ;;  %v1966_v22 = vpop.f32.mrb[123].mxu0  ;;  %v3284_v32 = vadd.f32 %v3283_v30, %v3282_v26 }
 0x223   : > { %v2626_v34 = vmax.f32 %v1964_v55, 0.0  ;;  %v1967_v20 = vadd.f32 %v5511_v45, %v1966_v22  ;;  %v2484_v33 = vadd.f32 %v5511_v45, %v5517_v35  ;;  %v3287_v63 = vsel %vm2762_vm0, %v2751_v53, 0.0 }
 0x224   : > { %v3016_v5 = vadd.f32 %v3015_v11, %v3014_v50  ;;  %v2629_v56 = vmax.f32 %v1975_v14, 0.0  ;;  %v3021_v10 = vsel %vm2762_vm0, %v2628_v19, 0.0  ;;  %v3286_v37 = vadd.f32 %v3285_v51, %v3284_v32 }
 0x225   : > { %v3017_v46 = vsel %vm2762_vm0, %v2626_v34, 0.0  ;;  %v2627_v52 = vmax.f32 %v1967_v20, 0.0  ;;  %v2476_v30 = vadd.f32 %v5511_v45, %v5520_v28  ;;  %v2487_v15 = vadd.f32 %v5511_v45, %v5525_v9 }
 0x226   : > { %v3018_v54 = vadd.f32 %v3017_v46, %v3016_v5  ;;  %v3023_v55 = vsel %vm2762_vm0, %v2629_v56, 0.0  ;;  %v3288_v60 = vadd.f32 %v3287_v63, %v3286_v37  ;;  %v2756_v19 = vmax.f32 %v2484_v33, 0.0 }
 0x227   : > { %v3019_v39 = vsel %vm2762_vm0, %v2627_v52, 0.0  ;;  %v4118_v23 = vpop.f32.mrb[124].mxu0  ;;  %v2754_v14 = vmax.f32 %v2476_v30, 0.0  ;;  %v2479_v22 = vadd.f32 %v5511_v45, %v5528_v12  ;;  %v2757_v56 = vmax.f32 %v2487_v15, 0.0 }
 0x228   : > { %v3020_v1 = vadd.f32 %v3019_v39, %v3018_v54  ;;  %v1988_v40 = vadd.f32 %v5511_v45, %v4118_v23  ;;  %v1979_v8 = vpop.f32.mrb[125].mxu0  ;;  %v3290_v34 = vadd.f32 %v3289_v2, %v3288_v60  ;;  %v3297_v54 = vsel %vm2762_vm0, %v2756_v19, 0.0 }
 0x229   : > { %v1980_v35 = vadd.f32 %v5511_v45, %v1979_v8  ;;  %v4119_v50 = vpop.f32.mrb[126].mxu0  ;;  %v3293_v5 = vsel %vm2762_vm0, %v2754_v14, 0.0  ;;  %v2755_v12 = vmax.f32 %v2479_v22, 0.0  ;;  %v3299_v63 = vsel %vm2762_vm0, %v2757_v56, 0.0 }
 0x22a   : > { %v3022_v26 = vadd.f32 %v3021_v10, %v3020_v1  ;;  %v2632_v28 = vmax.f32 %v1988_v40, 0.0  ;;  %v1991_v11 = vadd.f32 %v5511_v45, %v4119_v50  ;;  %v1982_v9 = vpop.f32.mrb[127].mxu0  ;;  %v3292_v46 = vadd.f32 %v3291_v42, %v3290_v34 }
 0x22b   : > { %v2630_v20 = vmax.f32 %v1980_v35, 0.0  ;;  %v1983_v51 = vadd.f32 %v5511_v45, %v1982_v9  ;;  %v3295_v30 = vsel %vm2762_vm0, %v2755_v12, 0.0  ;;  %v2492_v42 = vadd.f32 %v5511_v45, %v5548_v7 }
 0x22c   : > { %v3024_v32 = vadd.f32 %v3023_v55, %v3022_v26  ;;  %v3029_v10 = vsel %vm2762_vm0, %v2632_v28, 0.0  ;;  %v2633_v33 = vmax.f32 %v1991_v11, 0.0  ;;  %v3294_v39 = vadd.f32 %v3293_v5, %v3292_v46 }
 0x22d   : > { %v3025_v52 = vsel %vm2762_vm0, %v2630_v20, 0.0  ;;  %v2631_v53 = vmax.f32 %v1983_v51, 0.0  ;;  %v2500_v40 = vadd.f32 %v5511_v45, %v5545_v41  ;;  %v2503_v8 = vadd.f32 %v5511_v45, %v5553_v47 }
 0x22e   : > { %v3026_v37 = vadd.f32 %v3025_v52, %v3024_v32  ;;  %v3296_v1 = vadd.f32 %v3295_v30, %v3294_v39  ;;  %v2758_v19 = vmax.f32 %v2492_v42, 0.0  ;;  %v2495_v14 = vadd.f32 %v5511_v45, %v5556_v4 }
 0x22f   : > { %v3027_v2 = vsel %vm2762_vm0, %v2631_v53, 0.0  ;;  %v4122_v23 = vpop.f32.mrb[128].mxu0  ;;  %v3031_v11 = vsel %vm2762_vm0, %v2633_v33, 0.0  ;;  %v2760_v20 = vmax.f32 %v2500_v40, 0.0  ;;  %v2761_v32 = vmax.f32 %v2503_v8, 0.0 }
 0x230   : > { %v3028_v15 = vadd.f32 %v3027_v2, %v3026_v37  ;;  %v1995_v55 = vpop.f32.mrb[129].mxu0  ;;  %v2004_v60 = vadd.f32 %v5511_v45, %v4122_v23  ;;  %v3298_v28 = vadd.f32 %v3297_v54, %v3296_v1  ;;  %v3301_v47 = vsel %vm2762_vm0, %v2758_v19, 0.0 }
 0x231   : > { %v1996_v35 = vadd.f32 %v5511_v45, %v1995_v55  ;;  %v4123_v50 = vpop.f32.mrb[130].mxu0  ;;  %v2759_v46 = vmax.f32 %v2495_v14, 0.0  ;;  %v5825_v33 = vmov 0.0  }
 0x232   : > { %v3030_v22 = vadd.f32 %v3029_v10, %v3028_v15  ;;  %v2007_v7 = vadd.f32 %v5511_v45, %v4123_v50  ;;  %v1998_v26 = vpop.f32.mrb[131].mxu0  ;;  %v3300_v51 = vadd.f32 %v3299_v63, %v3298_v28  ;;  %v2636_v5 = vmax.f32 %v2004_v60, 0.0  ;;  %4252 = vmatprep.mubr.msk.bf16.mxu1 %vm4596_vm3, %v5825_v33 }
 0x233   : > { %v2634_v41 = vmax.f32 %v1996_v35, 0.0  ;;  %v1999_v9 = vadd.f32 %v5511_v45, %v1998_v26  ;;  %v3303_v37 = vsel %vm2762_vm0, %v2759_v46, 0.0  ;;  %v3305_v63 = vsel %vm2762_vm0, %v2760_v20, 0.0 }
 0x234   : > { %v3032_v34 = vadd.f32 %v3031_v11, %v3030_v22  ;;  %v2637_v52 = vmax.f32 %v2007_v7, 0.0  ;;  %v3302_v53 = vadd.f32 %v3301_v47, %v3300_v51  ;;  %v3042_v42 = vsel %vm2762_vm0, %v2636_v5, 0.0 }
 0x235   : > { %v2635_v56 = vmax.f32 %v1999_v9, 0.0  ;;  %v3039_v12 = vsel %vm2762_vm0, %v2634_v41, 0.0  ;;  %v3307_v50 = vsel %vm2762_vm0, %v2761_v32, 0.0  ;;  %v2028_v26 = vadd.f32 %v5511_v45, %v4912_v62 }
 0x236   : > { %v3033_v4 = vrot.slane %v3032_v34, 4  ;;  %v3304_v30 = vadd.f32 %v3303_v37, %v3302_v53  ;;  %v3044_v8 = vsel %vm2762_vm0, %v2637_v52, 0.0  ;;  %v2031_v5 = vadd.f32 %v5511_v45, %v4920_v6 }
 0x237   : > { %v3040_v54 = vsel %vm2762_vm0, %v2635_v56, 0.0  ;;  %v4126_v10 = vpop.f32.mrb[132].mxu0  ;;  %v2036_v62 = vadd.f32 %v5511_v45, %v4908_v58  ;;  %v2642_v52 = vmax.f32 %v2028_v26, 0.0  ;;  %v2044_v58 = vadd.f32 %v5511_v45, %v4930_v21 }
 0x238   : > { %v3034_v39 = vadd.f32 %v3033_v4, %v3032_v34  ;;  %v3041_v2 = vadd.f32 %v3040_v54, %v3039_v12  ;;  %v2011_v23 = vpop.f32.mrb[133].mxu0  ;;  %v2020_v15 = vadd.f32 %v5511_v45, %v4126_v10  ;;  %v3306_v7 = vadd.f32 %v3305_v63, %v3304_v30 }
 0x239   : > { %v2012_v55 = vadd.f32 %v5511_v45, %v2011_v23  ;;  %v4127_v1 = vpop.f32.mrb[134].mxu0  ;;  %v2039_v10 = vadd.f32 %v5511_v45, %v4917_v3  ;;  %v2643_v37 = vmax.f32 %v2031_v5, 0.0  ;;  %v2644_v23 = vmax.f32 %v2036_v62, 0.0 }
 0x23a   : > { %v3035_v40 = vrot.slane %v3034_v39, 2  ;;  %v3043_v60 = vadd.f32 %v3042_v42, %v3041_v2  ;;  %v2014_v35 = vpop.f32.mrb[135].mxu0  ;;  %v2023_v14 = vadd.f32 %v5511_v45, %v4127_v1  ;;  %v2640_v41 = vmax.f32 %v2020_v15, 0.0 }
 0x23b   : > { %v2638_v19 = vmax.f32 %v2012_v55, 0.0  ;;  %v2015_v22 = vadd.f32 %v5511_v45, %v2014_v35  ;;  %v5637_v34 = vadd.f32 %v3307_v50, %v3306_v7  ;;  %v3054_v63 = vsel %vm2762_vm0, %v2642_v52, 0.0 }
 0x23c   : > { %v3036_v28 = vadd.f32 %v3035_v40, %v3034_v39  ;;  %v3045_v11 = vadd.f32 %v3044_v8, %v3043_v60  ;;  %v2641_v56 = vmax.f32 %v2023_v14, 0.0  ;;  %v3050_v53 = vsel %vm2762_vm0, %v2640_v41, 0.0 }
 0x23d   : > { %v3046_v9 = vsel %vm2762_vm0, %v2638_v19, 0.0  ;;  %v2639_v47 = vmax.f32 %v2015_v22, 0.0  ;;  %v2645_v15 = vmax.f32 %v2039_v10, 0.0  ;;  %v3056_v55 = vsel %vm2762_vm0, %v2643_v37, 0.0 }
 0x23e   : > { %v3037_v20 = vrot.slane %v3036_v28, 1  ;;  %v3047_v51 = vadd.f32 %v3046_v9, %v3045_v11  ;;  %v3052_v6 = vsel %vm2762_vm0, %v2641_v56, 0.0  ;;  %v2047_v3 = vadd.f32 %v5511_v45, %v4939_v31 }
 0x23f   : > { %v3048_v32 = vsel %vm2762_vm0, %v2639_v47, 0.0  ;;  %v3058_v40 = vsel %vm2762_vm0, %v2644_v23, 0.0  ;;  %v2052_v8 = vadd.f32 %v5511_v45, %v4926_v16  ;;  %v2646_v60 = vmax.f32 %v2044_v58, 0.0 }
 0x240   : > { %v3038_v46 = vadd.f32 %v3037_v20, %v3036_v28  ;;  %v3049_v4 = vadd.f32 %v3048_v32, %v3047_v51  ;;  %v3060_v21 = vsel %vm2762_vm0, %v2645_v15, 0.0  ;;  %v2647_v50 = vmax.f32 %v2047_v3, 0.0 }
 0x241   : > { %v2648_v14 = vmax.f32 %v2052_v8, 0.0  ;;  %v3062_v22 = vsel %vm2762_vm0, %v2646_v60, 0.0  ;;  %v2060_v31 = vadd.f32 %v5511_v45, %v4950_v49  ;;  %v2063_v16 = vadd.f32 %v5511_v45, %v4958_v61 }
 0x242   : > { %v3318_v12 = vpack.c.bf16 %v3038_v46, %v3038_v46  ;;  %v3051_v54 = vadd.f32 %v3050_v53, %v3049_v4  ;;  %v3064_v28 = vsel %vm2762_vm0, %v2647_v50, 0.0  ;;  %v2071_v49 = vadd.f32 %v5511_v45, %v4956_v57 }
 0x243   : > { %v3066_v41 = vsel %vm2762_vm0, %v2648_v14, 0.0  ;;  %v2650_v9 = vmax.f32 %v2060_v31, 0.0  ;;  %v2651_v51 = vmax.f32 %v2063_v16, 0.0  ;;  %v2076_v61 = vadd.f32 %v5511_v45, %v4968_v18  ;;  %v5826_v31 = vld [vmem:[#allocation9_spill] sm:$0xff] }
 0x244   : > { %v3345_v39 = vunpack.c.l.b16 %v3318_v12  ;;  %v3053_v2 = vadd.f32 %v3052_v6, %v3051_v54  ;;  %v2653_v4 = vmax.f32 %v2071_v49, 0.0  ;;  %v2084_v57 = vadd.f32 %v5511_v45, %v4965_v13 }
 0x245   : > { %v3070_v32 = vsel %vm2762_vm0, %v2650_v9, 0.0  ;;  %v3072_v62 = vsel %vm2762_vm0, %v2651_v51, 0.0  ;;  %v2654_v12 = vmax.f32 %v2076_v61, 0.0  ;;  %v2087_v18 = vadd.f32 %v5511_v45, %v4974_v25 }
 0x246   : > { %v5652_v30 = vsel %vm3354_vm4, %v3345_v39, %v5474_v38  ;;  %v3055_v42 = vadd.f32 %v3054_v63, %v3053_v2  ;;  %v2055_v38 = vadd.f32 %v5511_v45, %v4936_v27  ;;  %v2068_v27 = vadd.f32 %v5511_v45, %v4946_v44 }
 0x247   : > { %v2079_v44 = vadd.f32 %v5511_v45, %v4976_v29  ;;  %v3076_v10 = vsel %vm2762_vm0, %v2653_v4, 0.0  ;;  %v2656_v39 = vmax.f32 %v2084_v57, 0.0  ;;  %v3078_v2 = vsel %vm2762_vm0, %v2654_v12, 0.0 }
 0x248   : > { %v3057_v1 = vadd.f32 %v3056_v55, %v3055_v42  ;;  %v2649_v26 = vmax.f32 %v2055_v38, 0.0  ;;  %v2652_v56 = vmax.f32 %v2068_v27, 0.0  ;;  %v2092_v29 = vadd.f32 %v5511_v45, %v4986_v48 }
 0x249   : > { %v2655_v37 = vmax.f32 %v2079_v44, 0.0  ;;  %v2657_v63 = vmax.f32 %v2087_v18, 0.0  ;;  %v2095_v13 = vadd.f32 %v5511_v45, %v4994_v0  ;;  %v3082_v15 = vsel %vm2762_vm0, %v2656_v39, 0.0 }
 0x24a   : > { %v3059_v35 = vadd.f32 %v3058_v40, %v3057_v1  ;;  %v3068_v20 = vsel %vm2762_vm0, %v2649_v26, 0.0  ;;  %v3074_v53 = vsel %vm2762_vm0, %v2652_v56, 0.0  ;;  %v2100_v25 = vadd.f32 %v5511_v45, %v4983_v43  ;;  %v5827_v26 = vld [vmem:[#allocation10_spill] sm:$0xff] }
 0x24b   : > { %v3080_v58 = vsel %vm2762_vm0, %v2655_v37, 0.0  ;;  %v2658_v55 = vmax.f32 %v2092_v29, 0.0  ;;  %v3084_v1 = vsel %vm2762_vm0, %v2657_v63, 0.0  ;;  %v2103_v48 = vadd.f32 %v5511_v45, %v4992_v59 }
 0x24c   : > { %v3061_v19 = vadd.f32 %v3060_v21, %v3059_v35  ;;  %v2659_v40 = vmax.f32 %v2095_v13, 0.0  ;;  %v2660_v60 = vmax.f32 %v2100_v25, 0.0  ;;  %v2108_v0 = vadd.f32 %v5511_v45, %v5005_v24 }
 0x24d   : > { %v3086_v35 = vsel %vm2762_vm0, %v2658_v55, 0.0  ;;  %v2661_v38 = vmax.f32 %v2103_v48, 0.0  ;;  %v2111_v43 = vadd.f32 %v5511_v45, %v5012_v36  ;;  %v2116_v59 = vadd.f32 %v5511_v45, %v5001_v17 }
 0x24e   : > { %v3063_v7 = vadd.f32 %v3062_v22, %v3061_v19  ;;  %v3088_v50 = vsel %vm2762_vm0, %v2659_v40, 0.0  ;;  %v3090_v14 = vsel %vm2762_vm0, %v2660_v60, 0.0  ;;  %v2662_v22 = vmax.f32 %v2108_v0, 0.0 }
 0x24f   : > { %v3092_v24 = vsel %vm2762_vm0, %v2661_v38, 0.0  ;;  %v2663_v27 = vmax.f32 %v2111_v43, 0.0  ;;  %v3309_v36 = vrot.slane %v5637_v34, 4  ;;  %v3812_v38 = vld [vmem:[%s5806_s4] ss:$0 sm:$0xff] }
 0x250   : > { %v3065_v11 = vadd.f32 %v3064_v28, %v3063_v7  ;;  %v3171_v7 = vrot.slane %v5826_v31, 4  ;;  %v3240_v28 = vrot.slane %v5827_v26, 4 }
 0x251   : > { %v3096_v56 = vsel %vm2762_vm0, %v2663_v27, 0.0 }
 0x252   : > { %v3067_v47 = vadd.f32 %v3066_v41, %v3065_v11  ;;  %v5828_v11 = vld [vmem:[#allocation8_spill] sm:$0xff]  ;;  %v3172_v17 = vadd.f32 %v3171_v7, %v5826_v31  ;;  %v3241_v49 = vadd.f32 %v3240_v28, %v5827_v26 }
 0x253   : > { %v2119_v41 = vadd.f32 %v5511_v45, %v5828_v11  ;;  %v4479_v11 = vld [vmem:[%s5807_s5 + $0x8] sm:$0xff]  }
 0x254   : > { %v3069_v5 = vadd.f32 %v3068_v20, %v3067_v47  ;;  %v2664_v47 = vmax.f32 %v2116_v59, 0.0  ;;  %v3094_v20 = vsel %vm2762_vm0, %v2662_v22, 0.0  ;;  %v3242_v4 = vrot.slane %v3241_v49, 2 }
 0x256   : > { %v3071_v46 = vadd.f32 %v3070_v32, %v3069_v5  ;;  %v2665_v5 = vmax.f32 %v2119_v41, 0.0  ;;  %v3310_v32 = vadd.f32 %v3309_v36, %v5637_v34  ;;  %v3098_v45 = vsel %vm2762_vm0, %v2664_v47, 0.0 }
 0x257   : > { %v3243_v12 = vadd.f32 %v3242_v4, %v3241_v49  ;;  %v3817_v49 = vld [vmem:[%s5808_s6] ss:$0 sm:$0xff] }
 0x258   : > { %v3073_v52 = vadd.f32 %v3072_v62, %v3071_v46  ;;  %v3173_v46 = vrot.slane %v3172_v17, 2  ;;  %v3100_v44 = vsel %vm2762_vm0, %v2665_v5, 0.0 }
 0x25a   : > { %v3075_v54 = vadd.f32 %v3074_v53, %v3073_v52  ;;  %v3311_v52 = vrot.slane %v3310_v32, 2  ;;  %v3174_v57 = vadd.f32 %v3173_v46, %v3172_v17  ;;  %v4481_v17 = vld [vmem:[%s5809_s7 + $0x8] sm:$0xff]  }
 0x25c   : > { %v3077_v6 = vadd.f32 %v3076_v10, %v3075_v54  ;;  %v3312_v10 = vadd.f32 %v3311_v52, %v3310_v32  ;;  %v3175_v37 = vrot.slane %v3174_v57, 1  ;;  %v3821_v52 = vld [vmem:[%s5810_s8] ss:$0 sm:$0xff] }
 0x25e   : > { %v3079_v23 = vadd.f32 %v3078_v2, %v3077_v6  ;;  %v3244_v6 = vrot.slane %v3243_v12, 1  ;;  %v3313_v2 = vrot.slane %v3312_v10, 1  ;;  %v3176_v29 = vadd.f32 %v3175_v37, %v3174_v57 }
 0x260   : > { %v3081_v42 = vadd.f32 %v3080_v58, %v3079_v23  ;;  %v3245_v23 = vadd.f32 %v3244_v6, %v3243_v12  ;;  %v3314_v58 = vadd.f32 %v3313_v2, %v3312_v10 }
 0x262   : > { %v3083_v3 = vadd.f32 %v3082_v15, %v3081_v42  ;;  %v3320_v42 = vpack.c.bf16 %v3176_v29, %v3176_v29  ;;  %v3321_v15 = vpack.c.bf16 %v3245_v23, %v3245_v23  ;;  %v3322_v55 = vpack.c.bf16 %v3314_v58, %v3314_v58 }
 0x264   : > { %v3085_v8 = vadd.f32 %v3084_v1, %v3083_v3  ;;  %v3347_v1 = vunpack.c.l.b16 %v3320_v42  ;;  %v3348_v48 = vunpack.c.l.b16 %v3321_v15 }
 0x266   : > { %v3087_v21 = vadd.f32 %v3086_v35, %v3085_v8  ;;  %v3349_v8 = vunpack.c.l.b16 %v3322_v55 }
 0x268   : > { %v3089_v19 = vadd.f32 %v3088_v50, %v3087_v21 }
 0x26a   : > { %v3091_v16 = vadd.f32 %v3090_v14, %v3089_v19 }
 0x26c   : > { %v3093_v9 = vadd.f32 %v3092_v24, %v3091_v16  ;;  %v4478_v24 = vld [vmem:[%s5807_s5] sm:$0xff]  }
 0x26e   : > { %v3095_v51 = vadd.f32 %v3094_v20, %v3093_v9  ;;  %v4480_v20 = vld [vmem:[%s5809_s7] sm:$0xff]  }
 0x270   : > { %v3097_v61 = vadd.f32 %v3096_v56, %v3095_v51 }
 0x272   : > { %v3099_v62 = vadd.f32 %v3098_v45, %v3097_v61 }
 0x274   : > { %v3101_v53 = vadd.f32 %v3100_v44, %v3099_v62 }
 0x276   : > { %v3102_v54 = vrot.slane %v3101_v53, 4 }
 0x278   : > { %v3103_v18 = vadd.f32 %v3102_v54, %v3101_v53 }
 0x27a   : > { %v3104_v39 = vrot.slane %v3103_v18, 2 }
 0x27c   : > { %v3105_v34 = vadd.f32 %v3104_v39, %v3103_v18 }
 0x27e   : > { %v3106_v63 = vrot.slane %v3105_v34, 1 }
 0x280   : > { %v3107_v13 = vadd.f32 %v3106_v63, %v3105_v34 }
 0x282   : > { %v3319_v25 = vpack.c.bf16 %v3107_v13, %v3107_v13 }
 0x284   : > { %v3346_v3 = vunpack.c.l.b16 %v3319_v25 }
 0x286   : > { %v3357_v40 = vsel %vm3356_vm5, %v3346_v3, %v5652_v30 }
 0x287   : > { %v3359_v60 = vsel %vm3358_vm6, %v3347_v1, %v3357_v40 }
 0x288   : > { %v3361_v35 = vsel %vm3360_vm7, %v3348_v48, %v3359_v60 }
 0x289   : > { %v3363_v0 = vsel %vm3362_vm8, %v3349_v8, %v3361_v35 }
 0x28a   : > { %v3364_v21 = vpack.c.b16 %v3363_v0, %v3363_v0 }
 0x28c   : > { %4253 = vmatmul.mubr.msk.bf16.vlgmr.msra.gmra.mrb[120].mxu1 %vm2762_vm0, %v3364_v21 }
 0x28d   : > { %4260 = vmatprep.mubr.msk.bf16.mxu1 %vm4596_vm3, %v5825_v33  ;;  %4257 = vmatpush3.bf16.msra.mxu1 %v4478_v24 }
 0x28e   : > { %4258 = vmatprep.subr.bf16.mxu1 %v5825_v33 }
 0x291   : > { %4259 = vmatpush3.bf16.msra.mxu1 %v4479_v11 }
 0x292   : > { %4264 = vmatprep.subr.bf16.mxu1 %v5825_v33 }
 0x35f   : > { %v3414_v50 = vpop.f32.mrb[120].mxu1 }
 0x360   : > { %v3415_v43 = vadd.f32 %v3812_v38, %v3414_v50  ;;  %v4254_v19 = vpop.f32.mrb[121].mxu1 }
 0x361   : > { %v3417_v14 = vpop.f32.mrb[122].mxu1 }
 0x362   : > { %4482 = vtanh.f32 %v3415_v43  ;;  %v4255_v30 = vpop.f32.mrb[123].mxu1  ;;  %v3816_v22 = vmul.f32 -1.442695, %v3415_v43 }
 0x364   : > { %4484 = vpow2.f32 %v3816_v22 }
 0x36c   : > { %v4483_v59 = vpop.eup %4482 }
 0x36d   : > { %3428 = vrot.lane.b32.xlu0 %v4483_v59, %s4597_s25  ;;  %s4599_s25 = smov [#allocation5]  }
 0x36e   : > { %v4485_v31 = vpop.eup %4484 }
 0x36f   : > { %v3423_v7 = vadd.f32 1.0, %v4485_v31 }
 0x371   : > { %4486 = vrcp.f32 %v3423_v7 }
 0x37b   : > { %v4487_v26 = vpop.eup %4486 }
 0x3df   : > { %v3429_v28 = vpop.permute.xlu0 %3428 }
 0x3e0   : > { %v3431_v16 = vmul.f32 %v4487_v26, %v3429_v28 }
 0x3e2   : > { %4488 = vtanh.f32 %v3431_v16 }
 0x3ec   : > { %v4489_v41 = vpop.eup %4488 }
 0x3ed   : > { %3434 = vrot.lane.b32.xlu0 %v4489_v41, %s4598_s14 }
 0x45f   : > { %v3435_v27 = vpop.permute.xlu0 %3434 }
 0x460   : > { %v3437_v36 = vmul.f32 %v4487_v26, %v3435_v27 }
 0x462   : > { %v3438_v9 = vpack.c.bf16 %v3437_v36, %v3437_v36 }
 0x464   : > { %3451 = vrot.lane.b32.xlu1 %v3438_v9, %s4598_s14  ;;  %s351_s14 = scalar_lea.vmem [#allocation5], %s3674_s23  ;;  %s4528_s23 = sshll.u32 %s4599_s25, 4  ;;  %s4529_s23 = int_to_ptr.vmem [resolvable:$false] %s4528_s23 }
 0x465   : > { %s3595_s16 = sshll.u32 %s351_s14, 4  ;;  %s4530_s24 = scalar_lea.vmem %s4529_s23, 256  ;;  %s5760_s16 = int_to_ptr.vmem [resolvable:$true] %s3595_s16 }
 0x466   : > { %s4524_s13 = scalar_lea.vmem %s5760_s16, 128  ;;  %p4531_p8 = scmp.lt.s32.totalorder %s5760_s16, %s4529_s23 }
 0x467   : > { %p4525_p6 = scmp.ne.s32.totalorder %s5760_s16, %s4524_s13  ;;  %p4532_p10 = scmp.lt.s32.totalorder %s4530_s24, %s4524_s13 }
 0x469   : > { %p4526_p12 = pnand %p4525_p6, %p5829_p11  ;;  %p4533_p0 = por %p4532_p10, %p4531_p8 }
 0x46b   : > { %p4527_p13 = pneg %p4526_p12 }
 0x46d   : > { %p4534_p2 = pnand %p4533_p0, %p4527_p13 }
 0x4d6   : > { %v3452_v47 = vpop.permute.xlu1 %3451 }
 0x4d7   : > { %4261 = vmatmul.mubr.msk.bf16.vlgmr.msra.gmra.mrb[124].mxu1 %vm2762_vm0, %v3452_v47 }
 0x4d8   : > { %4268 = vmatprep.mubr.msk.bf16.mxu1 %vm4596_vm3, %v5825_v33  ;;  %4265 = vmatpush3.bf16.msra.mxu1 %v4480_v20 }
 0x4d9   : > { %4266 = vmatprep.subr.bf16.mxu1 %v5825_v33 }
 0x4dc   : > { %4267 = vmatpush3.bf16.msra.mxu1 %v4481_v17 }
 0x5aa   : > { %v3502_v51 = vpop.f32.mrb[124].mxu1 }
 0x5ab   : > { %v3503_v5 = vadd.f32 %v3817_v49, %v3502_v51  ;;  %v4262_v56 = vpop.f32.mrb[125].mxu1 }
 0x5ac   : > { %v3505_v32 = vpop.f32.mrb[126].mxu1 }
 0x5ad   : > { %v3509_v61 = vmul.f32 0.70710677, %v3503_v5  ;;  %v4263_v45 = vpop.f32.mrb[127].mxu1  ;;  %v3508_v33 = vmul.f32 0.5, %v3503_v5 }
 0x5af   : > { %4490 = verf.f32 %v3509_v61 }
 0x5b9   : > { %v4491_v46 = vpop.eup %4490 }
 0x5ba   : > { %v3511_v4 = vadd.f32 1.0, %v4491_v46 }
 0x5bc   : > { %v3512_v62 = vmul.f32 %v3511_v4, %v3508_v33 }
 0x5be   : > { %v3513_v44 = vpack.c.bf16 %v3512_v62, %v3512_v62 }
 0x5c0   : > { %4269 = vmatmul.mubr.msk.bf16.vlgmr.msra.gmra.mrb[128].mxu1 %vm2762_vm0, %v3513_v44 }
 0x693   : > { %v3574_v53 = vpop.f32.mrb[128].mxu1 }
 0x694   : > { %v3575_v57 = vadd.f32 %v3821_v52, %v3574_v53  ;;  %v4270_v12 = vpop.f32.mrb[129].mxu1 }
 0x695   : > { %v3577_v54 = vpop.f32.mrb[130].mxu1 }
 0x696   : > { %3580 = vst [vmem:[%s351_s14] sm:$0xff] %v3575_v57  ;;  %v4271_v10 = vpop.f32.mrb[131].mxu1 }
 0x697   : > { %4537 = shalt.err (!%p4534_p2)
}
 0x698   : > { %s4538_s29 = scalar_lea.hbm %s5758_s26, 128  ;;  %s4542_s14 = scalar_lea.hbm %s5811_s9, 256 }
 0x699   : > { %p4539_p4 = scmp.ne.s32.totalorder %s5758_s26, %s4538_s29  ;;  %p4543_p9 = scmp.lt.u32.totalorder %s5758_s26, %s5811_s9 }
 0x69a   : > { %p4544_p1 = scmp.lt.u32.totalorder %s4542_s14, %s4538_s29  ;;  %p4546_p6 = scmp.lt.u32.totalorder %s4538_s29, %s5758_s26 }
 0x69b   : > { %p4540_p5 = pnand %p4539_p4, %p5829_p11 }
 0x69c   : > { %p4545_p3 = por %p4544_p1, %p4543_p9 }
 0x69d   : > { %p4541_p7 = pneg %p4540_p5 }
 0x69e   : > { %p4547_p12 = por %p4546_p6, %p4545_p3 }
 0x6a0   : > { %p4548_p13 = pnand %p4547_p12, %p4541_p7 }
 0x6a2   : > { %4551 = shalt.err (!%p4548_p13)
}
 0x6a3   : > { %4290 = dma.vmem_to_hbm [thread:$0]  (%p5829_p11), %s5760_s16, 128, %s5758_s26, %s3582_s20  }
 0x6a4 PF: > { %s3607_s13 = sand.u32 1, %s4578_s30   ;;  %p5830_p8 = scmp.ne.s32.totalorder %s5820_s22, 0 }
 0x6a5   : > { %p5831_p10 = scmp.ge.s32.totalorder %s4590_s12, 2  ;;  %s3608_s25 = scalar_lea.sflag [#allocation4], %s3607_s13 }
 0x6a7   : > { %p4297_p0 = pnand %p5831_p10, %p5830_p8 }
 0x6a9   : > { %4573 = dma.done.wait (!%p4297_p0), %s3608_s25, 128  }
 0x6aa   : > { %4575 = vsyncadd (!%p4297_p0), %s3608_s25, 4294967168  ;;  %p22_p2 = scmp.ge.s32.totalorder %s4675_s15, 4   ;;  %s5832_s30 = smov %s4582_s10 }
 0x6ab   : > { %s5833_s10 = smov %s4586_s11  ;;  %s5834_s11 = smov %s4687_s18 }
 0x6ac   : > { %s5835_s12 = smov %s4675_s15  ;;  %24 = sbr.rel (!%p22_p2) target bundleno = 5 (0x5), region = 101 }
 0x6b3   :  { %3613 = vsyncpa [#allocation3], 1 }
 0x6b4   :  { %3615 = vsyncpa [#allocation3 + $0x1], 1 }
 0x6b5   :  { %3616 = vsyncpa [#allocation4], 1 }
 0x6b6   :  { %3618 = vsyncpa [#allocation4 + $0x1], 1 }

</bundles_post_ra>
